<compile_context>
chip_gen: v7x
topology: tpu7x:2x2x1
jax: 0.10.0
libtpu: 0.0.40
codegen_flags: <defaults>
</compile_context>

<pallas_src>
import functools

import jax
import jax.numpy as jnp
from jax import lax
from jax.experimental import pallas as pl
from jax.experimental.pallas import tpu as pltpu


def _dfc_kl_kernel(x_ref, cluster_ref, proto_ref, *, stride, K, stage_num):
    # Native (c, n) layout: n on the lane axis -> full VPU/EUP lane occupancy
    # for the per-batch normalization / log, and lane-dense (K, n) cluster maps.
    x = x_ref[0].astype(jnp.float32)                       # (c, n)
    c, n = x.shape

    # x -= amin; x /= amax (recomputed after the shift); x += 1e-6
    # Scalar reciprocal of the max -> one (sub, mul, add) pass over the slab.
    mn = jnp.min(x)
    x_shift = x - mn
    inv_mx = jnp.float32(1.0) / jnp.max(x_shift)
    x = x_shift * inv_mx + jnp.float32(1e-6)               # (c, n) f32
    log_x = jnp.log(x)                                     # (c, n) f32 (EUP)

    # bf16 copies feed the MXU: both contractions are K-row "skinny" matmuls
    # bound by pushing the (c, n) slab through the MXU, so bf16 halves that
    # push traffic and the live VMEM footprint across the stage loop.
    x_bf = x.astype(jnp.bfloat16)                          # (c, n) bf16
    lx_bf = log_x.astype(jnp.bfloat16)                     # (c, n) bf16

    kk = lax.broadcasted_iota(jnp.int32, (K, n), 0)        # prototype-index grid
    jj = lax.broadcasted_iota(jnp.int32, (K, n), 1)        # point-index grid

    # prototype init = x[:, grid]^T via one one-hot selection matmul
    # (replaces a K-way single-row slice concatenate / lane gather).
    sel = jnp.where(jj == kk * stride, jnp.float32(1.0),
                    jnp.float32(0.0)).astype(jnp.bfloat16)             # (K, n)
    proto0 = lax.dot_general(sel, x_bf,
                             dimension_numbers=(((1,), (1,)), ((), ())),
                             preferred_element_type=jnp.float32)       # (K, c)

    bmap0 = jnp.zeros((K, n), jnp.float32)                 # accumulative b_map
    cl0 = jnp.zeros((1, n), jnp.int32)

    def body(_, carry):
        proto, bmap, _cl = carry
        # kl_dis(prototype, x): dis[k, j] = sum_c p[k,c]*(log p[k,c] - log x[j,c])
        # TODO(synk): an empty prototype row gives 0*log(0)=NaN here, matching the
        # reference's degenerate behaviour; no guard added to preserve semantics.
        ent = jnp.sum(proto * jnp.log(proto), axis=-1, keepdims=True)   # (K, 1)
        cross = jnp.dot(proto.astype(jnp.bfloat16), lx_bf,
                        preferred_element_type=jnp.float32)             # (K, n)
        dis = ent - cross
        # torch.min(dis, dim=-2): value + FIRST index achieving the minimum.
        dmin = jnp.min(dis, axis=0, keepdims=True)                      # (1, n)
        cl = jnp.min(jnp.where(dis == dmin, kk, jnp.int32(K)),
                     axis=0, keepdims=True)                             # (1, n)
        # b_map.scatter_(1, cluster, True): accumulative boolean membership.
        onehot = (kk == cl).astype(jnp.float32)                         # (K, n)
        bmap = jnp.maximum(bmap, onehot)
        # prototype[k, :] = sum_j b_map[k, j] * x[:, j] / (sum_j b_map[k, j] + 1e-6)
        proto = lax.dot_general(bmap.astype(jnp.bfloat16), x_bf,
                                dimension_numbers=(((1,), (1,)), ((), ())),
                                preferred_element_type=jnp.float32)     # (K, c)
        proto = proto / (jnp.sum(bmap, axis=-1, keepdims=True) + jnp.float32(1e-6))
        return proto, bmap, cl

    # stage_num is small and static -> fully unroll so the LLO scheduler sees
    # the whole body (MXU / XLU / EUP slots interleave across stages).
    proto, bmap, cl = lax.fori_loop(0, stage_num, body, (proto0, bmap0, cl0),
                                    unroll=True)

    cluster_ref[0] = cl                                    # (1, n) int32
    proto_ref[0] = proto.astype(proto_ref.dtype)           # (K, c) f32


def dfc_kl_2d(x, number_cluster, stage_num=10):
    """x: (bs, c, n) float32 — same layout as the PyTorch module input."""
    bs, c, n = x.shape
    stride = n // number_cluster
    assert stride > 0, "n must be >= number_cluster"
    # K == len(torch.arange(0, n, stride)); may differ from number_cluster
    # when n is not divisible by it, matching the PyTorch behaviour.
    K = -(-n // stride)
    x = x.astype(jnp.float32)

    kernel = functools.partial(_dfc_kl_kernel, stride=stride, K=K,
                               stage_num=stage_num)

    # VMEM budget (explicit, important on v7x's 64 MiB):
    #   2x f32 input block (double-buffered) + transient f32 x/log_x
    #   + live bf16 x/log_x + (K,n) maps + output blocks + headroom.
    slab_f32 = n * c * 4
    slab_bf16 = n * c * 2
    vmem_bytes = (4 * slab_f32 + 2 * slab_bf16
                  + 6 * K * n * 4
                  + 4 * (n * 4 + K * c * 4)
                  + (4 << 20))
    vmem_limit = int(min(max(vmem_bytes, 16 << 20), 120 << 20))

    # The kernel does ~stage_num more compute per byte than its I/O suggests;
    # tell XLA so it schedules/overlaps around the call correctly.
    cost = pl.CostEstimate(
        flops=4 * bs * stage_num * K * n * c,
        transcendentals=bs * (n * c + stage_num * K * c),
        bytes_accessed=bs * (n * c * 4 + n * 4 + K * c * 4),
    )

    cluster3, proto = pl.pallas_call(
        kernel,
        out_shape=(jax.ShapeDtypeStruct((bs, 1, n), jnp.int32),
                   jax.ShapeDtypeStruct((bs, K, c), jnp.float32)),
        grid_spec=pltpu.PrefetchScalarGridSpec(
            num_scalar_prefetch=0,
            grid=(bs,),
            in_specs=[pl.BlockSpec((1, c, n), lambda b: (b, 0, 0))],
            out_specs=(pl.BlockSpec((1, 1, n), lambda b: (b, 0, 0)),
                       pl.BlockSpec((1, K, c), lambda b: (b, 0, 0)))),
        compiler_params=pltpu.CompilerParams(
            # megacore shards the batch grid on v7x; no-op on v5e/v6e.
            # TODO(synk): for bs==1 on v7x the second TensorCore idles; an
            # n-split with a cross-core reduction would be needed to use it.
            dimension_semantics=("parallel",),
            vmem_limit_bytes=vmem_limit),
        cost_estimate=cost,
    )(x)

    # torch.min indices are int64; int32 cluster ids are returned here.
    # TODO(synk): the reference 'kl' branch returns an undefined `similarity`
    # (NameError in PyTorch), so only (cluster, prototype) are returned.
    return cluster3.reshape(bs, n), proto


if __name__ == "__main__":
    key = jax.random.PRNGKey(0)
    bs, c, n = 2, 16, 32                 # x: "bs c n" per the module docstring
    number_cluster = 4
    x = jax.random.uniform(key, (bs, c, n), dtype=jnp.float32)

    cluster, prototype = dfc_kl_2d(x, number_cluster, stage_num=10)
    jax.block_until_ready((cluster, prototype))

    assert cluster.shape == (bs, n) and cluster.dtype == jnp.int32
    assert prototype.shape == (bs, number_cluster, c)
    print("KERNEL_OK")
</pallas_src>

<mosaic_0001>
module attributes {stable_mosaic.version = 11 : i64} {
  func.func @_dfc_kl_kernel(%arg0: i32, %arg1: memref<1x16x32xf32, #tpu.memory_space<vmem>>, %arg2: memref<1x1x32xi32, #tpu.memory_space<vmem>>, %arg3: memref<1x4x16xf32, #tpu.memory_space<vmem>>) attributes {dimension_semantics = [#tpu.dimension_semantics<parallel>], iteration_bounds = array<i64: 2>, scalar_prefetch = 0 : i64, scratch_operands = 0 : i64, tpu.core_type = #tpu.core_type<tc>, window_params = [{transform_indices = @transform_0, window_bounds = array<i64: 1, 16, 32>}, {transform_indices = @transform_1, window_bounds = array<i64: 1, 1, 32>}, {transform_indices = @transform_2, window_bounds = array<i64: 1, 4, 16>}]} {
    %c0 = arith.constant 0 : index
    %c0_0 = arith.constant 0 : index
    %c0_1 = arith.constant 0 : index
    %0 = vector.load %arg1[%c0, %c0_0, %c0_1] : memref<1x16x32xf32, #tpu.memory_space<vmem>>, vector<1x16x32xf32>
    %1 = vector.shape_cast %0 : vector<1x16x32xf32> to vector<16x32xf32>
    %2 = vector.shape_cast %1 : vector<16x32xf32> to vector<1x16x32xf32>
    %cst = arith.constant dense<0x7F800000> : vector<1xf32>
    %3 = vector.multi_reduction <minimumf>, %2, %cst [1, 2] : vector<1x16x32xf32> to vector<1xf32>
    %4 = vector.shape_cast %3 : vector<1xf32> to vector<1x1x1xf32>
    %5 = vector.extract %4[0, 0, 0] : f32 from vector<1x1x1xf32>
    %6 = vector.broadcast %5 : f32 to vector<16x32xf32>
    %7 = arith.subf %1, %6 : vector<16x32xf32>
    %8 = vector.shape_cast %7 : vector<16x32xf32> to vector<1x16x32xf32>
    %cst_2 = arith.constant dense<0xFF800000> : vector<1xf32>
    %9 = vector.multi_reduction <maximumf>, %8, %cst_2 [1, 2] : vector<1x16x32xf32> to vector<1xf32>
    %10 = vector.shape_cast %9 : vector<1xf32> to vector<1x1x1xf32>
    %11 = vector.extract %10[0, 0, 0] : f32 from vector<1x1x1xf32>
    %cst_3 = arith.constant 1.000000e+00 : f32
    %12 = arith.divf %cst_3, %11 : f32
    %13 = vector.broadcast %12 : f32 to vector<16x32xf32>
    %14 = arith.mulf %7, %13 : vector<16x32xf32>
    %cst_4 = arith.constant 9.99999997E-7 : f32
    %15 = vector.broadcast %cst_4 : f32 to vector<16x32xf32>
    %16 = arith.addf %14, %15 : vector<16x32xf32>
    %17 = math.log %16 : vector<16x32xf32>
    %18 = arith.truncf %16 : vector<16x32xf32> to vector<16x32xbf16>
    %19 = arith.truncf %17 : vector<16x32xf32> to vector<16x32xbf16>
    %20 = tpu.iota {dimensions = array<i32: 0>} : vector<4x32xi32>
    %21 = tpu.iota {dimensions = array<i32: 1>} : vector<4x32xi32>
    %c8_i32 = arith.constant 8 : i32
    %22 = vector.broadcast %c8_i32 : i32 to vector<4x32xi32>
    %23 = arith.muli %20, %22 : vector<4x32xi32>
    %24 = arith.cmpi eq, %21, %23 : vector<4x32xi32>
    %cst_5 = arith.constant 1.000000e+00 : f32
    %cst_6 = arith.constant 0.000000e+00 : f32
    %25 = vector.broadcast %cst_5 : f32 to vector<4x32xf32>
    %26 = vector.broadcast %cst_6 : f32 to vector<4x32xf32>
    %27 = arith.select %24, %25, %26 : vector<4x32xi1>, vector<4x32xf32>
    %28 = arith.truncf %27 : vector<4x32xf32> to vector<4x32xbf16>
    %cst_7 = arith.constant dense<0.000000e+00> : vector<4x16xf32>
    %29 = tpu.matmul %28, %18, %cst_7 {dimension_numbers = #tpu.dot_dimension_numbers<[1], [1], [0], [0], [0, 0, 1, 0], [], []>} : vector<4x32xbf16>, vector<16x32xbf16>, vector<4x16xf32> -> vector<4x16xf32>
    %cst_8 = arith.constant 0.000000e+00 : f32
    %30 = vector.broadcast %cst_8 : f32 to vector<4x32xf32>
    %c0_i32 = arith.constant 0 : i32
    %31 = vector.broadcast %c0_i32 : i32 to vector<1x32xi32>
    %c0_i32_9 = arith.constant 0 : i32
    %32 = math.log %29 : vector<4x16xf32>
    %33 = arith.mulf %29, %32 : vector<4x16xf32>
    %cst_10 = arith.constant dense<0.000000e+00> : vector<4xf32>
    %34 = vector.multi_reduction <add>, %33, %cst_10 [1] : vector<4x16xf32> to vector<4xf32>
    %35 = vector.shape_cast %34 : vector<4xf32> to vector<4x1xf32>
    %36 = arith.truncf %29 : vector<4x16xf32> to vector<4x16xbf16>
    %cst_11 = arith.constant dense<0.000000e+00> : vector<4x32xf32>
    %37 = tpu.matmul %36, %19, %cst_11 {dimension_numbers = #tpu.dot_dimension_numbers<[1], [0], [0], [1], [0, 0, 1, 1], [], []>} : vector<4x16xbf16>, vector<16x32xbf16>, vector<4x32xf32> -> vector<4x32xf32>
    %38 = vector.broadcast %35 : vector<4x1xf32> to vector<4x32xf32>
    %39 = arith.subf %38, %37 : vector<4x32xf32>
    %cst_12 = arith.constant dense<0x7F800000> : vector<32xf32>
    %40 = vector.multi_reduction <minimumf>, %39, %cst_12 [0] : vector<4x32xf32> to vector<32xf32>
    %41 = vector.shape_cast %40 : vector<32xf32> to vector<1x32xf32>
    %42 = vector.broadcast %41 : vector<1x32xf32> to vector<4x32xf32>
    %43 = arith.cmpf oeq, %39, %42 : vector<4x32xf32>
    %c4_i32 = arith.constant 4 : i32
    %44 = vector.broadcast %c4_i32 : i32 to vector<4x32xi32>
    %45 = arith.select %43, %20, %44 : vector<4x32xi1>, vector<4x32xi32>
    %cst_13 = arith.constant dense<2147483647> : vector<32xi32>
    %46 = vector.multi_reduction <minsi>, %45, %cst_13 [0] : vector<4x32xi32> to vector<32xi32>
    %47 = vector.shape_cast %46 : vector<32xi32> to vector<1x32xi32>
    %48 = vector.broadcast %47 : vector<1x32xi32> to vector<4x32xi32>
    %49 = arith.cmpi eq, %20, %48 : vector<4x32xi32>
    %50 = arith.extui %49 : vector<4x32xi1> to vector<4x32xi32>
    %51 = arith.sitofp %50 : vector<4x32xi32> to vector<4x32xf32>
    %52 = arith.maximumf %30, %51 : vector<4x32xf32>
    %53 = arith.truncf %52 : vector<4x32xf32> to vector<4x32xbf16>
    %cst_14 = arith.constant dense<0.000000e+00> : vector<4x16xf32>
    %54 = tpu.matmul %53, %18, %cst_14 {dimension_numbers = #tpu.dot_dimension_numbers<[1], [1], [0], [0], [0, 0, 1, 0], [], []>} : vector<4x32xbf16>, vector<16x32xbf16>, vector<4x16xf32> -> vector<4x16xf32>
    %cst_15 = arith.constant dense<0.000000e+00> : vector<4xf32>
    %55 = vector.multi_reduction <add>, %52, %cst_15 [1] : vector<4x32xf32> to vector<4xf32>
    %56 = vector.shape_cast %55 : vector<4xf32> to vector<4x1xf32>
    %cst_16 = arith.constant 9.99999997E-7 : f32
    %57 = vector.broadcast %cst_16 : f32 to vector<4x1xf32>
    %58 = arith.addf %56, %57 : vector<4x1xf32>
    %59 = vector.broadcast %58 : vector<4x1xf32> to vector<4x16xf32>
    %60 = arith.divf %54, %59 : vector<4x16xf32>
    %c1_i32 = arith.constant 1 : i32
    %61 = math.log %60 : vector<4x16xf32>
    %62 = arith.mulf %60, %61 : vector<4x16xf32>
    %cst_17 = arith.constant dense<0.000000e+00> : vector<4xf32>
    %63 = vector.multi_reduction <add>, %62, %cst_17 [1] : vector<4x16xf32> to vector<4xf32>
    %64 = vector.shape_cast %63 : vector<4xf32> to vector<4x1xf32>
    %65 = arith.truncf %60 : vector<4x16xf32> to vector<4x16xbf16>
    %cst_18 = arith.constant dense<0.000000e+00> : vector<4x32xf32>
    %66 = tpu.matmul %65, %19, %cst_18 {dimension_numbers = #tpu.dot_dimension_numbers<[1], [0], [0], [1], [0, 0, 1, 1], [], []>} : vector<4x16xbf16>, vector<16x32xbf16>, vector<4x32xf32> -> vector<4x32xf32>
    %67 = vector.broadcast %64 : vector<4x1xf32> to vector<4x32xf32>
    %68 = arith.subf %67, %66 : vector<4x32xf32>
    %cst_19 = arith.constant dense<0x7F800000> : vector<32xf32>
    %69 = vector.multi_reduction <minimumf>, %68, %cst_19 [0] : vector<4x32xf32> to vector<32xf32>
    %70 = vector.shape_cast %69 : vector<32xf32> to vector<1x32xf32>
    %71 = vector.broadcast %70 : vector<1x32xf32> to vector<4x32xf32>
    %72 = arith.cmpf oeq, %68, %71 : vector<4x32xf32>
    %c4_i32_20 = arith.constant 4 : i32
    %73 = vector.broadcast %c4_i32_20 : i32 to vector<4x32xi32>
    %74 = arith.select %72, %20, %73 : vector<4x32xi1>, vector<4x32xi32>
    %cst_21 = arith.constant dense<2147483647> : vector<32xi32>
    %75 = vector.multi_reduction <minsi>, %74, %cst_21 [0] : vector<4x32xi32> to vector<32xi32>
    %76 = vector.shape_cast %75 : vector<32xi32> to vector<1x32xi32>
    %77 = vector.broadcast %76 : vector<1x32xi32> to vector<4x32xi32>
    %78 = arith.cmpi eq, %20, %77 : vector<4x32xi32>
    %79 = arith.extui %78 : vector<4x32xi1> to vector<4x32xi32>
    %80 = arith.sitofp %79 : vector<4x32xi32> to vector<4x32xf32>
    %81 = arith.maximumf %52, %80 : vector<4x32xf32>
    %82 = arith.truncf %81 : vector<4x32xf32> to vector<4x32xbf16>
    %cst_22 = arith.constant dense<0.000000e+00> : vector<4x16xf32>
    %83 = tpu.matmul %82, %18, %cst_22 {dimension_numbers = #tpu.dot_dimension_numbers<[1], [1], [0], [0], [0, 0, 1, 0], [], []>} : vector<4x32xbf16>, vector<16x32xbf16>, vector<4x16xf32> -> vector<4x16xf32>
    %cst_23 = arith.constant dense<0.000000e+00> : vector<4xf32>
    %84 = vector.multi_reduction <add>, %81, %cst_23 [1] : vector<4x32xf32> to vector<4xf32>
    %85 = vector.shape_cast %84 : vector<4xf32> to vector<4x1xf32>
    %cst_24 = arith.constant 9.99999997E-7 : f32
    %86 = vector.broadcast %cst_24 : f32 to vector<4x1xf32>
    %87 = arith.addf %85, %86 : vector<4x1xf32>
    %88 = vector.broadcast %87 : vector<4x1xf32> to vector<4x16xf32>
    %89 = arith.divf %83, %88 : vector<4x16xf32>
    %c2_i32 = arith.constant 2 : i32
    %90 = math.log %89 : vector<4x16xf32>
    %91 = arith.mulf %89, %90 : vector<4x16xf32>
    %cst_25 = arith.constant dense<0.000000e+00> : vector<4xf32>
    %92 = vector.multi_reduction <add>, %91, %cst_25 [1] : vector<4x16xf32> to vector<4xf32>
    %93 = vector.shape_cast %92 : vector<4xf32> to vector<4x1xf32>
    %94 = arith.truncf %89 : vector<4x16xf32> to vector<4x16xbf16>
    %cst_26 = arith.constant dense<0.000000e+00> : vector<4x32xf32>
    %95 = tpu.matmul %94, %19, %cst_26 {dimension_numbers = #tpu.dot_dimension_numbers<[1], [0], [0], [1], [0, 0, 1, 1], [], []>} : vector<4x16xbf16>, vector<16x32xbf16>, vector<4x32xf32> -> vector<4x32xf32>
    %96 = vector.broadcast %93 : vector<4x1xf32> to vector<4x32xf32>
    %97 = arith.subf %96, %95 : vector<4x32xf32>
    %cst_27 = arith.constant dense<0x7F800000> : vector<32xf32>
    %98 = vector.multi_reduction <minimumf>, %97, %cst_27 [0] : vector<4x32xf32> to vector<32xf32>
    %99 = vector.shape_cast %98 : vector<32xf32> to vector<1x32xf32>
    %100 = vector.broadcast %99 : vector<1x32xf32> to vector<4x32xf32>
    %101 = arith.cmpf oeq, %97, %100 : vector<4x32xf32>
    %c4_i32_28 = arith.constant 4 : i32
    %102 = vector.broadcast %c4_i32_28 : i32 to vector<4x32xi32>
    %103 = arith.select %101, %20, %102 : vector<4x32xi1>, vector<4x32xi32>
    %cst_29 = arith.constant dense<2147483647> : vector<32xi32>
    %104 = vector.multi_reduction <minsi>, %103, %cst_29 [0] : vector<4x32xi32> to vector<32xi32>
    %105 = vector.shape_cast %104 : vector<32xi32> to vector<1x32xi32>
    %106 = vector.broadcast %105 : vector<1x32xi32> to vector<4x32xi32>
    %107 = arith.cmpi eq, %20, %106 : vector<4x32xi32>
    %108 = arith.extui %107 : vector<4x32xi1> to vector<4x32xi32>
    %109 = arith.sitofp %108 : vector<4x32xi32> to vector<4x32xf32>
    %110 = arith.maximumf %81, %109 : vector<4x32xf32>
    %111 = arith.truncf %110 : vector<4x32xf32> to vector<4x32xbf16>
    %cst_30 = arith.constant dense<0.000000e+00> : vector<4x16xf32>
    %112 = tpu.matmul %111, %18, %cst_30 {dimension_numbers = #tpu.dot_dimension_numbers<[1], [1], [0], [0], [0, 0, 1, 0], [], []>} : vector<4x32xbf16>, vector<16x32xbf16>, vector<4x16xf32> -> vector<4x16xf32>
    %cst_31 = arith.constant dense<0.000000e+00> : vector<4xf32>
    %113 = vector.multi_reduction <add>, %110, %cst_31 [1] : vector<4x32xf32> to vector<4xf32>
    %114 = vector.shape_cast %113 : vector<4xf32> to vector<4x1xf32>
    %cst_32 = arith.constant 9.99999997E-7 : f32
    %115 = vector.broadcast %cst_32 : f32 to vector<4x1xf32>
    %116 = arith.addf %114, %115 : vector<4x1xf32>
    %117 = vector.broadcast %116 : vector<4x1xf32> to vector<4x16xf32>
    %118 = arith.divf %112, %117 : vector<4x16xf32>
    %c3_i32 = arith.constant 3 : i32
    %119 = math.log %118 : vector<4x16xf32>
    %120 = arith.mulf %118, %119 : vector<4x16xf32>
    %cst_33 = arith.constant dense<0.000000e+00> : vector<4xf32>
    %121 = vector.multi_reduction <add>, %120, %cst_33 [1] : vector<4x16xf32> to vector<4xf32>
    %122 = vector.shape_cast %121 : vector<4xf32> to vector<4x1xf32>
    %123 = arith.truncf %118 : vector<4x16xf32> to vector<4x16xbf16>
    %cst_34 = arith.constant dense<0.000000e+00> : vector<4x32xf32>
    %124 = tpu.matmul %123, %19, %cst_34 {dimension_numbers = #tpu.dot_dimension_numbers<[1], [0], [0], [1], [0, 0, 1, 1], [], []>} : vector<4x16xbf16>, vector<16x32xbf16>, vector<4x32xf32> -> vector<4x32xf32>
    %125 = vector.broadcast %122 : vector<4x1xf32> to vector<4x32xf32>
    %126 = arith.subf %125, %124 : vector<4x32xf32>
    %cst_35 = arith.constant dense<0x7F800000> : vector<32xf32>
    %127 = vector.multi_reduction <minimumf>, %126, %cst_35 [0] : vector<4x32xf32> to vector<32xf32>
    %128 = vector.shape_cast %127 : vector<32xf32> to vector<1x32xf32>
    %129 = vector.broadcast %128 : vector<1x32xf32> to vector<4x32xf32>
    %130 = arith.cmpf oeq, %126, %129 : vector<4x32xf32>
    %c4_i32_36 = arith.constant 4 : i32
    %131 = vector.broadcast %c4_i32_36 : i32 to vector<4x32xi32>
    %132 = arith.select %130, %20, %131 : vector<4x32xi1>, vector<4x32xi32>
    %cst_37 = arith.constant dense<2147483647> : vector<32xi32>
    %133 = vector.multi_reduction <minsi>, %132, %cst_37 [0] : vector<4x32xi32> to vector<32xi32>
    %134 = vector.shape_cast %133 : vector<32xi32> to vector<1x32xi32>
    %135 = vector.broadcast %134 : vector<1x32xi32> to vector<4x32xi32>
    %136 = arith.cmpi eq, %20, %135 : vector<4x32xi32>
    %137 = arith.extui %136 : vector<4x32xi1> to vector<4x32xi32>
    %138 = arith.sitofp %137 : vector<4x32xi32> to vector<4x32xf32>
    %139 = arith.maximumf %110, %138 : vector<4x32xf32>
    %140 = arith.truncf %139 : vector<4x32xf32> to vector<4x32xbf16>
    %cst_38 = arith.constant dense<0.000000e+00> : vector<4x16xf32>
    %141 = tpu.matmul %140, %18, %cst_38 {dimension_numbers = #tpu.dot_dimension_numbers<[1], [1], [0], [0], [0, 0, 1, 0], [], []>} : vector<4x32xbf16>, vector<16x32xbf16>, vector<4x16xf32> -> vector<4x16xf32>
    %cst_39 = arith.constant dense<0.000000e+00> : vector<4xf32>
    %142 = vector.multi_reduction <add>, %139, %cst_39 [1] : vector<4x32xf32> to vector<4xf32>
    %143 = vector.shape_cast %142 : vector<4xf32> to vector<4x1xf32>
    %cst_40 = arith.constant 9.99999997E-7 : f32
    %144 = vector.broadcast %cst_40 : f32 to vector<4x1xf32>
    %145 = arith.addf %143, %144 : vector<4x1xf32>
    %146 = vector.broadcast %145 : vector<4x1xf32> to vector<4x16xf32>
    %147 = arith.divf %141, %146 : vector<4x16xf32>
    %c4_i32_41 = arith.constant 4 : i32
    %148 = math.log %147 : vector<4x16xf32>
    %149 = arith.mulf %147, %148 : vector<4x16xf32>
    %cst_42 = arith.constant dense<0.000000e+00> : vector<4xf32>
    %150 = vector.multi_reduction <add>, %149, %cst_42 [1] : vector<4x16xf32> to vector<4xf32>
    %151 = vector.shape_cast %150 : vector<4xf32> to vector<4x1xf32>
    %152 = arith.truncf %147 : vector<4x16xf32> to vector<4x16xbf16>
    %cst_43 = arith.constant dense<0.000000e+00> : vector<4x32xf32>
    %153 = tpu.matmul %152, %19, %cst_43 {dimension_numbers = #tpu.dot_dimension_numbers<[1], [0], [0], [1], [0, 0, 1, 1], [], []>} : vector<4x16xbf16>, vector<16x32xbf16>, vector<4x32xf32> -> vector<4x32xf32>
    %154 = vector.broadcast %151 : vector<4x1xf32> to vector<4x32xf32>
    %155 = arith.subf %154, %153 : vector<4x32xf32>
    %cst_44 = arith.constant dense<0x7F800000> : vector<32xf32>
    %156 = vector.multi_reduction <minimumf>, %155, %cst_44 [0] : vector<4x32xf32> to vector<32xf32>
    %157 = vector.shape_cast %156 : vector<32xf32> to vector<1x32xf32>
    %158 = vector.broadcast %157 : vector<1x32xf32> to vector<4x32xf32>
    %159 = arith.cmpf oeq, %155, %158 : vector<4x32xf32>
    %c4_i32_45 = arith.constant 4 : i32
    %160 = vector.broadcast %c4_i32_45 : i32 to vector<4x32xi32>
    %161 = arith.select %159, %20, %160 : vector<4x32xi1>, vector<4x32xi32>
    %cst_46 = arith.constant dense<2147483647> : vector<32xi32>
    %162 = vector.multi_reduction <minsi>, %161, %cst_46 [0] : vector<4x32xi32> to vector<32xi32>
    %163 = vector.shape_cast %162 : vector<32xi32> to vector<1x32xi32>
    %164 = vector.broadcast %163 : vector<1x32xi32> to vector<4x32xi32>
    %165 = arith.cmpi eq, %20, %164 : vector<4x32xi32>
    %166 = arith.extui %165 : vector<4x32xi1> to vector<4x32xi32>
    %167 = arith.sitofp %166 : vector<4x32xi32> to vector<4x32xf32>
    %168 = arith.maximumf %139, %167 : vector<4x32xf32>
    %169 = arith.truncf %168 : vector<4x32xf32> to vector<4x32xbf16>
    %cst_47 = arith.constant dense<0.000000e+00> : vector<4x16xf32>
    %170 = tpu.matmul %169, %18, %cst_47 {dimension_numbers = #tpu.dot_dimension_numbers<[1], [1], [0], [0], [0, 0, 1, 0], [], []>} : vector<4x32xbf16>, vector<16x32xbf16>, vector<4x16xf32> -> vector<4x16xf32>
    %cst_48 = arith.constant dense<0.000000e+00> : vector<4xf32>
    %171 = vector.multi_reduction <add>, %168, %cst_48 [1] : vector<4x32xf32> to vector<4xf32>
    %172 = vector.shape_cast %171 : vector<4xf32> to vector<4x1xf32>
    %cst_49 = arith.constant 9.99999997E-7 : f32
    %173 = vector.broadcast %cst_49 : f32 to vector<4x1xf32>
    %174 = arith.addf %172, %173 : vector<4x1xf32>
    %175 = vector.broadcast %174 : vector<4x1xf32> to vector<4x16xf32>
    %176 = arith.divf %170, %175 : vector<4x16xf32>
    %c5_i32 = arith.constant 5 : i32
    %177 = math.log %176 : vector<4x16xf32>
    %178 = arith.mulf %176, %177 : vector<4x16xf32>
    %cst_50 = arith.constant dense<0.000000e+00> : vector<4xf32>
    %179 = vector.multi_reduction <add>, %178, %cst_50 [1] : vector<4x16xf32> to vector<4xf32>
    %180 = vector.shape_cast %179 : vector<4xf32> to vector<4x1xf32>
    %181 = arith.truncf %176 : vector<4x16xf32> to vector<4x16xbf16>
    %cst_51 = arith.constant dense<0.000000e+00> : vector<4x32xf32>
    %182 = tpu.matmul %181, %19, %cst_51 {dimension_numbers = #tpu.dot_dimension_numbers<[1], [0], [0], [1], [0, 0, 1, 1], [], []>} : vector<4x16xbf16>, vector<16x32xbf16>, vector<4x32xf32> -> vector<4x32xf32>
    %183 = vector.broadcast %180 : vector<4x1xf32> to vector<4x32xf32>
    %184 = arith.subf %183, %182 : vector<4x32xf32>
    %cst_52 = arith.constant dense<0x7F800000> : vector<32xf32>
    %185 = vector.multi_reduction <minimumf>, %184, %cst_52 [0] : vector<4x32xf32> to vector<32xf32>
    %186 = vector.shape_cast %185 : vector<32xf32> to vector<1x32xf32>
    %187 = vector.broadcast %186 : vector<1x32xf32> to vector<4x32xf32>
    %188 = arith.cmpf oeq, %184, %187 : vector<4x32xf32>
    %c4_i32_53 = arith.constant 4 : i32
    %189 = vector.broadcast %c4_i32_53 : i32 to vector<4x32xi32>
    %190 = arith.select %188, %20, %189 : vector<4x32xi1>, vector<4x32xi32>
    %cst_54 = arith.constant dense<2147483647> : vector<32xi32>
    %191 = vector.multi_reduction <minsi>, %190, %cst_54 [0] : vector<4x32xi32> to vector<32xi32>
    %192 = vector.shape_cast %191 : vector<32xi32> to vector<1x32xi32>
    %193 = vector.broadcast %192 : vector<1x32xi32> to vector<4x32xi32>
    %194 = arith.cmpi eq, %20, %193 : vector<4x32xi32>
    %195 = arith.extui %194 : vector<4x32xi1> to vector<4x32xi32>
    %196 = arith.sitofp %195 : vector<4x32xi32> to vector<4x32xf32>
    %197 = arith.maximumf %168, %196 : vector<4x32xf32>
    %198 = arith.truncf %197 : vector<4x32xf32> to vector<4x32xbf16>
    %cst_55 = arith.constant dense<0.000000e+00> : vector<4x16xf32>
    %199 = tpu.matmul %198, %18, %cst_55 {dimension_numbers = #tpu.dot_dimension_numbers<[1], [1], [0], [0], [0, 0, 1, 0], [], []>} : vector<4x32xbf16>, vector<16x32xbf16>, vector<4x16xf32> -> vector<4x16xf32>
    %cst_56 = arith.constant dense<0.000000e+00> : vector<4xf32>
    %200 = vector.multi_reduction <add>, %197, %cst_56 [1] : vector<4x32xf32> to vector<4xf32>
    %201 = vector.shape_cast %200 : vector<4xf32> to vector<4x1xf32>
    %cst_57 = arith.constant 9.99999997E-7 : f32
    %202 = vector.broadcast %cst_57 : f32 to vector<4x1xf32>
    %203 = arith.addf %201, %202 : vector<4x1xf32>
    %204 = vector.broadcast %203 : vector<4x1xf32> to vector<4x16xf32>
    %205 = arith.divf %199, %204 : vector<4x16xf32>
    %c6_i32 = arith.constant 6 : i32
    %206 = math.log %205 : vector<4x16xf32>
    %207 = arith.mulf %205, %206 : vector<4x16xf32>
    %cst_58 = arith.constant dense<0.000000e+00> : vector<4xf32>
    %208 = vector.multi_reduction <add>, %207, %cst_58 [1] : vector<4x16xf32> to vector<4xf32>
    %209 = vector.shape_cast %208 : vector<4xf32> to vector<4x1xf32>
    %210 = arith.truncf %205 : vector<4x16xf32> to vector<4x16xbf16>
    %cst_59 = arith.constant dense<0.000000e+00> : vector<4x32xf32>
    %211 = tpu.matmul %210, %19, %cst_59 {dimension_numbers = #tpu.dot_dimension_numbers<[1], [0], [0], [1], [0, 0, 1, 1], [], []>} : vector<4x16xbf16>, vector<16x32xbf16>, vector<4x32xf32> -> vector<4x32xf32>
    %212 = vector.broadcast %209 : vector<4x1xf32> to vector<4x32xf32>
    %213 = arith.subf %212, %211 : vector<4x32xf32>
    %cst_60 = arith.constant dense<0x7F800000> : vector<32xf32>
    %214 = vector.multi_reduction <minimumf>, %213, %cst_60 [0] : vector<4x32xf32> to vector<32xf32>
    %215 = vector.shape_cast %214 : vector<32xf32> to vector<1x32xf32>
    %216 = vector.broadcast %215 : vector<1x32xf32> to vector<4x32xf32>
    %217 = arith.cmpf oeq, %213, %216 : vector<4x32xf32>
    %c4_i32_61 = arith.constant 4 : i32
    %218 = vector.broadcast %c4_i32_61 : i32 to vector<4x32xi32>
    %219 = arith.select %217, %20, %218 : vector<4x32xi1>, vector<4x32xi32>
    %cst_62 = arith.constant dense<2147483647> : vector<32xi32>
    %220 = vector.multi_reduction <minsi>, %219, %cst_62 [0] : vector<4x32xi32> to vector<32xi32>
    %221 = vector.shape_cast %220 : vector<32xi32> to vector<1x32xi32>
    %222 = vector.broadcast %221 : vector<1x32xi32> to vector<4x32xi32>
    %223 = arith.cmpi eq, %20, %222 : vector<4x32xi32>
    %224 = arith.extui %223 : vector<4x32xi1> to vector<4x32xi32>
    %225 = arith.sitofp %224 : vector<4x32xi32> to vector<4x32xf32>
    %226 = arith.maximumf %197, %225 : vector<4x32xf32>
    %227 = arith.truncf %226 : vector<4x32xf32> to vector<4x32xbf16>
    %cst_63 = arith.constant dense<0.000000e+00> : vector<4x16xf32>
    %228 = tpu.matmul %227, %18, %cst_63 {dimension_numbers = #tpu.dot_dimension_numbers<[1], [1], [0], [0], [0, 0, 1, 0], [], []>} : vector<4x32xbf16>, vector<16x32xbf16>, vector<4x16xf32> -> vector<4x16xf32>
    %cst_64 = arith.constant dense<0.000000e+00> : vector<4xf32>
    %229 = vector.multi_reduction <add>, %226, %cst_64 [1] : vector<4x32xf32> to vector<4xf32>
    %230 = vector.shape_cast %229 : vector<4xf32> to vector<4x1xf32>
    %cst_65 = arith.constant 9.99999997E-7 : f32
    %231 = vector.broadcast %cst_65 : f32 to vector<4x1xf32>
    %232 = arith.addf %230, %231 : vector<4x1xf32>
    %233 = vector.broadcast %232 : vector<4x1xf32> to vector<4x16xf32>
    %234 = arith.divf %228, %233 : vector<4x16xf32>
    %c7_i32 = arith.constant 7 : i32
    %235 = math.log %234 : vector<4x16xf32>
    %236 = arith.mulf %234, %235 : vector<4x16xf32>
    %cst_66 = arith.constant dense<0.000000e+00> : vector<4xf32>
    %237 = vector.multi_reduction <add>, %236, %cst_66 [1] : vector<4x16xf32> to vector<4xf32>
    %238 = vector.shape_cast %237 : vector<4xf32> to vector<4x1xf32>
    %239 = arith.truncf %234 : vector<4x16xf32> to vector<4x16xbf16>
    %cst_67 = arith.constant dense<0.000000e+00> : vector<4x32xf32>
    %240 = tpu.matmul %239, %19, %cst_67 {dimension_numbers = #tpu.dot_dimension_numbers<[1], [0], [0], [1], [0, 0, 1, 1], [], []>} : vector<4x16xbf16>, vector<16x32xbf16>, vector<4x32xf32> -> vector<4x32xf32>
    %241 = vector.broadcast %238 : vector<4x1xf32> to vector<4x32xf32>
    %242 = arith.subf %241, %240 : vector<4x32xf32>
    %cst_68 = arith.constant dense<0x7F800000> : vector<32xf32>
    %243 = vector.multi_reduction <minimumf>, %242, %cst_68 [0] : vector<4x32xf32> to vector<32xf32>
    %244 = vector.shape_cast %243 : vector<32xf32> to vector<1x32xf32>
    %245 = vector.broadcast %244 : vector<1x32xf32> to vector<4x32xf32>
    %246 = arith.cmpf oeq, %242, %245 : vector<4x32xf32>
    %c4_i32_69 = arith.constant 4 : i32
    %247 = vector.broadcast %c4_i32_69 : i32 to vector<4x32xi32>
    %248 = arith.select %246, %20, %247 : vector<4x32xi1>, vector<4x32xi32>
    %cst_70 = arith.constant dense<2147483647> : vector<32xi32>
    %249 = vector.multi_reduction <minsi>, %248, %cst_70 [0] : vector<4x32xi32> to vector<32xi32>
    %250 = vector.shape_cast %249 : vector<32xi32> to vector<1x32xi32>
    %251 = vector.broadcast %250 : vector<1x32xi32> to vector<4x32xi32>
    %252 = arith.cmpi eq, %20, %251 : vector<4x32xi32>
    %253 = arith.extui %252 : vector<4x32xi1> to vector<4x32xi32>
    %254 = arith.sitofp %253 : vector<4x32xi32> to vector<4x32xf32>
    %255 = arith.maximumf %226, %254 : vector<4x32xf32>
    %256 = arith.truncf %255 : vector<4x32xf32> to vector<4x32xbf16>
    %cst_71 = arith.constant dense<0.000000e+00> : vector<4x16xf32>
    %257 = tpu.matmul %256, %18, %cst_71 {dimension_numbers = #tpu.dot_dimension_numbers<[1], [1], [0], [0], [0, 0, 1, 0], [], []>} : vector<4x32xbf16>, vector<16x32xbf16>, vector<4x16xf32> -> vector<4x16xf32>
    %cst_72 = arith.constant dense<0.000000e+00> : vector<4xf32>
    %258 = vector.multi_reduction <add>, %255, %cst_72 [1] : vector<4x32xf32> to vector<4xf32>
    %259 = vector.shape_cast %258 : vector<4xf32> to vector<4x1xf32>
    %cst_73 = arith.constant 9.99999997E-7 : f32
    %260 = vector.broadcast %cst_73 : f32 to vector<4x1xf32>
    %261 = arith.addf %259, %260 : vector<4x1xf32>
    %262 = vector.broadcast %261 : vector<4x1xf32> to vector<4x16xf32>
    %263 = arith.divf %257, %262 : vector<4x16xf32>
    %c8_i32_74 = arith.constant 8 : i32
    %264 = math.log %263 : vector<4x16xf32>
    %265 = arith.mulf %263, %264 : vector<4x16xf32>
    %cst_75 = arith.constant dense<0.000000e+00> : vector<4xf32>
    %266 = vector.multi_reduction <add>, %265, %cst_75 [1] : vector<4x16xf32> to vector<4xf32>
    %267 = vector.shape_cast %266 : vector<4xf32> to vector<4x1xf32>
    %268 = arith.truncf %263 : vector<4x16xf32> to vector<4x16xbf16>
    %cst_76 = arith.constant dense<0.000000e+00> : vector<4x32xf32>
    %269 = tpu.matmul %268, %19, %cst_76 {dimension_numbers = #tpu.dot_dimension_numbers<[1], [0], [0], [1], [0, 0, 1, 1], [], []>} : vector<4x16xbf16>, vector<16x32xbf16>, vector<4x32xf32> -> vector<4x32xf32>
    %270 = vector.broadcast %267 : vector<4x1xf32> to vector<4x32xf32>
    %271 = arith.subf %270, %269 : vector<4x32xf32>
    %cst_77 = arith.constant dense<0x7F800000> : vector<32xf32>
    %272 = vector.multi_reduction <minimumf>, %271, %cst_77 [0] : vector<4x32xf32> to vector<32xf32>
    %273 = vector.shape_cast %272 : vector<32xf32> to vector<1x32xf32>
    %274 = vector.broadcast %273 : vector<1x32xf32> to vector<4x32xf32>
    %275 = arith.cmpf oeq, %271, %274 : vector<4x32xf32>
    %c4_i32_78 = arith.constant 4 : i32
    %276 = vector.broadcast %c4_i32_78 : i32 to vector<4x32xi32>
    %277 = arith.select %275, %20, %276 : vector<4x32xi1>, vector<4x32xi32>
    %cst_79 = arith.constant dense<2147483647> : vector<32xi32>
    %278 = vector.multi_reduction <minsi>, %277, %cst_79 [0] : vector<4x32xi32> to vector<32xi32>
    %279 = vector.shape_cast %278 : vector<32xi32> to vector<1x32xi32>
    %280 = vector.broadcast %279 : vector<1x32xi32> to vector<4x32xi32>
    %281 = arith.cmpi eq, %20, %280 : vector<4x32xi32>
    %282 = arith.extui %281 : vector<4x32xi1> to vector<4x32xi32>
    %283 = arith.sitofp %282 : vector<4x32xi32> to vector<4x32xf32>
    %284 = arith.maximumf %255, %283 : vector<4x32xf32>
    %285 = arith.truncf %284 : vector<4x32xf32> to vector<4x32xbf16>
    %cst_80 = arith.constant dense<0.000000e+00> : vector<4x16xf32>
    %286 = tpu.matmul %285, %18, %cst_80 {dimension_numbers = #tpu.dot_dimension_numbers<[1], [1], [0], [0], [0, 0, 1, 0], [], []>} : vector<4x32xbf16>, vector<16x32xbf16>, vector<4x16xf32> -> vector<4x16xf32>
    %cst_81 = arith.constant dense<0.000000e+00> : vector<4xf32>
    %287 = vector.multi_reduction <add>, %284, %cst_81 [1] : vector<4x32xf32> to vector<4xf32>
    %288 = vector.shape_cast %287 : vector<4xf32> to vector<4x1xf32>
    %cst_82 = arith.constant 9.99999997E-7 : f32
    %289 = vector.broadcast %cst_82 : f32 to vector<4x1xf32>
    %290 = arith.addf %288, %289 : vector<4x1xf32>
    %291 = vector.broadcast %290 : vector<4x1xf32> to vector<4x16xf32>
    %292 = arith.divf %286, %291 : vector<4x16xf32>
    %c9_i32 = arith.constant 9 : i32
    %293 = math.log %292 : vector<4x16xf32>
    %294 = arith.mulf %292, %293 : vector<4x16xf32>
    %cst_83 = arith.constant dense<0.000000e+00> : vector<4xf32>
    %295 = vector.multi_reduction <add>, %294, %cst_83 [1] : vector<4x16xf32> to vector<4xf32>
    %296 = vector.shape_cast %295 : vector<4xf32> to vector<4x1xf32>
    %297 = arith.truncf %292 : vector<4x16xf32> to vector<4x16xbf16>
    %cst_84 = arith.constant dense<0.000000e+00> : vector<4x32xf32>
    %298 = tpu.matmul %297, %19, %cst_84 {dimension_numbers = #tpu.dot_dimension_numbers<[1], [0], [0], [1], [0, 0, 1, 1], [], []>} : vector<4x16xbf16>, vector<16x32xbf16>, vector<4x32xf32> -> vector<4x32xf32>
    %299 = vector.broadcast %296 : vector<4x1xf32> to vector<4x32xf32>
    %300 = arith.subf %299, %298 : vector<4x32xf32>
    %cst_85 = arith.constant dense<0x7F800000> : vector<32xf32>
    %301 = vector.multi_reduction <minimumf>, %300, %cst_85 [0] : vector<4x32xf32> to vector<32xf32>
    %302 = vector.shape_cast %301 : vector<32xf32> to vector<1x32xf32>
    %303 = vector.broadcast %302 : vector<1x32xf32> to vector<4x32xf32>
    %304 = arith.cmpf oeq, %300, %303 : vector<4x32xf32>
    %c4_i32_86 = arith.constant 4 : i32
    %305 = vector.broadcast %c4_i32_86 : i32 to vector<4x32xi32>
    %306 = arith.select %304, %20, %305 : vector<4x32xi1>, vector<4x32xi32>
    %cst_87 = arith.constant dense<2147483647> : vector<32xi32>
    %307 = vector.multi_reduction <minsi>, %306, %cst_87 [0] : vector<4x32xi32> to vector<32xi32>
    %308 = vector.shape_cast %307 : vector<32xi32> to vector<1x32xi32>
    %309 = vector.broadcast %308 : vector<1x32xi32> to vector<4x32xi32>
    %310 = arith.cmpi eq, %20, %309 : vector<4x32xi32>
    %311 = arith.extui %310 : vector<4x32xi1> to vector<4x32xi32>
    %312 = arith.sitofp %311 : vector<4x32xi32> to vector<4x32xf32>
    %313 = arith.maximumf %284, %312 : vector<4x32xf32>
    %314 = arith.truncf %313 : vector<4x32xf32> to vector<4x32xbf16>
    %cst_88 = arith.constant dense<0.000000e+00> : vector<4x16xf32>
    %315 = tpu.matmul %314, %18, %cst_88 {dimension_numbers = #tpu.dot_dimension_numbers<[1], [1], [0], [0], [0, 0, 1, 0], [], []>} : vector<4x32xbf16>, vector<16x32xbf16>, vector<4x16xf32> -> vector<4x16xf32>
    %cst_89 = arith.constant dense<0.000000e+00> : vector<4xf32>
    %316 = vector.multi_reduction <add>, %313, %cst_89 [1] : vector<4x32xf32> to vector<4xf32>
    %317 = vector.shape_cast %316 : vector<4xf32> to vector<4x1xf32>
    %cst_90 = arith.constant 9.99999997E-7 : f32
    %318 = vector.broadcast %cst_90 : f32 to vector<4x1xf32>
    %319 = arith.addf %317, %318 : vector<4x1xf32>
    %320 = vector.broadcast %319 : vector<4x1xf32> to vector<4x16xf32>
    %321 = arith.divf %315, %320 : vector<4x16xf32>
    %c0_91 = arith.constant 0 : index
    %c0_92 = arith.constant 0 : index
    %c0_93 = arith.constant 0 : index
    %322 = vector.load %arg2[%c0_91, %c0_92, %c0_93] : memref<1x1x32xi32, #tpu.memory_space<vmem>>, vector<1x1x32xi32>
    %323 = vector.shape_cast %322 : vector<1x1x32xi32> to vector<1x32xi32>
    %324 = vector.shape_cast %308 : vector<1x32xi32> to vector<1x1x32xi32>
    tpu.vector_store %arg2[%c0_91, %c0_92, %c0_93], %324 {strides = array<i32>} : memref<1x1x32xi32, #tpu.memory_space<vmem>>, vector<1x1x32xi32>,
    %c0_94 = arith.constant 0 : index
    %c0_95 = arith.constant 0 : index
    %c0_96 = arith.constant 0 : index
    %325 = vector.load %arg3[%c0_94, %c0_95, %c0_96] : memref<1x4x16xf32, #tpu.memory_space<vmem>>, vector<1x4x16xf32>
    %326 = vector.shape_cast %325 : vector<1x4x16xf32> to vector<4x16xf32>
    %327 = vector.shape_cast %321 : vector<4x16xf32> to vector<1x4x16xf32>
    tpu.vector_store %arg3[%c0_94, %c0_95, %c0_96], %327 {strides = array<i32>} : memref<1x4x16xf32, #tpu.memory_space<vmem>>, vector<1x4x16xf32>,
    return
  }
  func.func @transform_0(%arg0: i32) -> (i32, i32, i32) {
    %c0_i32 = arith.constant 0 : i32
    %c0_i32_0 = arith.constant 0 : i32
    %c0_i32_1 = arith.constant 0 : i32
    return %arg0, %c0_i32, %c0_i32_0 : i32, i32, i32
  }
  func.func @transform_1(%arg0: i32) -> (i32, i32, i32) {
    %c0_i32 = arith.constant 0 : i32
    %c0_i32_0 = arith.constant 0 : i32
    %c0_i32_1 = arith.constant 0 : i32
    return %arg0, %c0_i32, %c0_i32_0 : i32, i32, i32
  }
  func.func @transform_2(%arg0: i32) -> (i32, i32, i32) {
    %c0_i32 = arith.constant 0 : i32
    %c0_i32_0 = arith.constant 0 : i32
    %c0_i32_1 = arith.constant 0 : i32
    return %arg0, %c0_i32, %c0_i32_0 : i32, i32, i32
  }
}

</mosaic_0001>

<bundles_post_ra>
// kernel: tpu_custom_call.1
= control target key start
LH: loop header
LB: loop body
LE: loop exit
PB: predicated region body
PF: predicated region fallthrough
CT: control target
= control target key end

     0   :  { %8 = vsyncpa [#allocation3], 0  ;;  %s2494_s0 = inlined_call_operand.hbm [shape: f32[2,16,32], index: 0, kind: input, shape index: {}]   ;;  %s2495_s1 = inlined_call_operand.hbm [shape: s32[2,1,32], index: 1, kind: output, shape index: {0}]   ;;  %s2496_s2 = inlined_call_operand.hbm [shape: f32[2,4,16], index: 2, kind: output, shape index: {1}]  }
   0x1   :  { %10 = vsyncpa [#allocation3 + $0x1], 0 }
   0x2   :  { %11 = vsyncpa [#allocation4], 0 }
   0x3   :  { %13 = vsyncpa [#allocation4 + $0x1], 0 }
   0x4   :  { %14 = vsyncpa [#allocation7], 0 }
   0x5   :  { %16 = vsyncpa [#allocation7 + $0x1], 0  ;;  %s2119_s9 = smov 0   ;;  %s2121_s10 = smov 0  }
   0x6   :  { %s2123_s11 = smov 0   ;;  %s2125_s12 = smov 0  }
   0x7 LB: > { %s2140_s13 = sadd.s32 4294967295, %s2095_s12   ;;  %s1646_s14 = sadd.s32 4294967294, %s2095_s12   ;;  %s2095_s12 = sphi %s2125_s12, %s2509_s12   ;;  %s2091_s11 = sphi %s2123_s11, %s2508_s11   ;;  %s2087_s10 = sphi %s2121_s10, %s2507_s10   ;;  %s2083_s9 = sphi %s2119_s9, %s2506_s9  }
   0x8   : > { %s2144_s15 = sadd.s32 1, %s2095_s12   ;;  %s29_s16 = sadd.s32 1, %s2091_s11 }
   0x9   : > { %s26_s17 = ssub.s32 %s2095_s12, %s2144_s15  ;;  %p36_p0 = scmp.ne.s32.totalorder %s2091_s11, %s2087_s10 }
   0xa   : > { %p27_p1 = scmp.eq.s32.totalorder %s26_s17, 0  ;;  %p37_p2 = scmp.eq.s32.totalorder %s2095_s12, 0 }
   0xb   : > { %p42_p3 = scmp.ne.s32.totalorder %s2087_s10, %s2083_s9  ;;  %p43_p4 = scmp.eq.s32.totalorder %s2140_s13, 0 }
   0xc   : > { %s2156_s18 = scalar_select %p27_p1, %s2091_s11, %s29_s16  }
   0xd   : > { %p2158_p5 = por %p37_p2, %p36_p0  ;;  %p2162_p6 = por %p43_p4, %p42_p3 }
   0xe   : > { %p66_p7 = scmp.eq.s32.totalorder %s2140_s13, 1  ;;  %p72_p8 = scmp.eq.s32.totalorder %s1646_s14, 1 }
   0xf   : > { %p1883_p10 = scmp.lt.s32.totalorder %s2095_s12, 2  ;;  %s118_s23 = sand.u32 1, %s2091_s11  }
  0x10   : > { %p2169_p11 = por %p66_p7, %p36_p0  ;;  %p2173_p12 = por %p72_p8, %p42_p3 }
  0x11   : > { %s1691_s24 = sshll.u32 %s2095_s12, 8  ;;  %s1649_s25 = sshll.u32 %s118_s23, 4 }
  0x12   : > { %s2500_s21 = scalar_select %p2169_p11, 1, 0 }
  0x13   : > { %s2501_s22 = scalar_select %p2173_p12, 1, 0 }
  0x14   : > { %s2182_s28 = scalar_lea.hbm %s2494_s0, %s1691_s24  ;;  %s122_s29 = scalar_lea.vmem [#allocation2], %s1649_s25 }
  0x15   : > { %s129_s30 = sshll.u32 %s122_s29, 4  ;;  %p2186_p13 = pnand %p1883_p10, %p2158_p5  ;;  %s2190_s30 = int_to_ptr.vmem [resolvable:$true] %s129_s30 }
  0x16   : > { %s2192_s4 = scalar_lea.sflag [#allocation3], %s118_s23  ;;  %s1967_s5 = scalar_lea.hbm %s2182_s28, 256 }
  0x17   : > { %p1968_p0 = scmp.ne.s32.totalorder %s2182_s28, %s1967_s5  ;;  %p1969_p1 = pneg %p2186_p13 }
  0x18   : > { %s1972_s8 = scalar_lea.hbm %s2494_s0, 512  ;;  %p1973_p4 = scmp.lt.u32.totalorder %s2182_s28, %s2494_s0 }
  0x19   : > { %p1970_p2 = pnand %p1969_p1, %p1968_p0  ;;  %p1974_p5 = scmp.lt.u32.totalorder %s1972_s8, %s1967_s5 }
  0x1a   : > { %p1976_p8 = scmp.lt.u32.totalorder %s1967_s5, %s2182_s28 }
  0x1b   : > { %p1971_p3 = pneg %p1970_p2  ;;  %p1975_p7 = por %p1974_p5, %p1973_p4 }
  0x1d   : > { %p1977_p10 = por %p1976_p8, %p1975_p7 }
  0x1f   : > { %p1978_p9 = pnand %p1977_p10, %p1971_p3 }
  0x21   : > { %1981 = shalt.err (!%p1978_p9)
}
  0x22   : > { %s1982_s17 = scalar_lea.vmem %s2190_s30, 256  ;;  %s2097_s19 = smov [#allocation2]  }
  0x23   : > { %p1983_p0 = scmp.ne.s32.totalorder %s2190_s30, %s1982_s17  ;;  %s1987_s23 = sshll.u32 %s2097_s19, 4  ;;  %s1988_s23 = int_to_ptr.vmem [resolvable:$false] %s1987_s23 }
  0x24   : > { %s1989_s24 = scalar_lea.vmem %s1988_s23, 512  ;;  %p1990_p11 = scmp.lt.s32.totalorder %s2190_s30, %s1988_s23 }
  0x25   : > { %p1985_p2 = pnand %p1983_p0, %p1969_p1  ;;  %p1991_p4 = scmp.lt.s32.totalorder %s1989_s24, %s1982_s17 }
  0x27   : > { %p1986_p12 = pneg %p1985_p2  ;;  %p1992_p5 = por %p1991_p4, %p1990_p11 }
  0x29   : > { %p1993_p7 = pnand %p1992_p5, %p1986_p12 }
  0x2b   : > { %1996 = shalt.err (!%p1993_p7)
}
  0x2c   : > { %s2098_s25 = smov 128   ;;  %s2099_s26 = smov 8  }
  0x2d   : > { %1875 = dma.hbm_to_vmem [thread:$0]  (!%p2186_p13), %s2182_s28, 256, %s2190_s30, %s2192_s4, %s2098_s25, %s2098_s25, %s2099_s26  }
  0x2e   : > { %p1652_p9 = scmp.ge.s32.totalorder %s2095_s12, 1  ;;  %p137_p1 = scmp.lt.s32.totalorder %s2095_s12, 3 }
  0x30   : > { %p138_p3 = pnand %p1652_p9, %p137_p1 }
  0x31   : > { %s2223_s27 = sand.u32 (!%p138_p3), 1, %s2087_s10  }
  0x32   : > { %141 = sbr.rel (%p138_p3) target bundleno = 5419 (0x152b), region = 24  ;;  %s1653_s29 = sshll.u32 (!%p138_p3), %s2223_s27, 4 }
  0x33   : > { %s144_s5 = scalar_lea.sflag (!%p138_p3), [#allocation3], %s2223_s27  ;;  %s147_s6 = scalar_lea.vmem (!%p138_p3), [#allocation2], %s1653_s29 }
  0x39   : > { %2070 = dma.done.wait (%p2162_p6), %s144_s5, 256  }
  0x3a   : > { %2072 = vsyncadd (%p2162_p6), %s144_s5, 4294967040  ;;  %vm175_vm0 = vcmask 261120   ;;  %v173_v0 = vld [vmem:[%s147_s6] sm:$0xff]  ;;  %v174_v1 = vld [vmem:[%s147_s6 + $0x8] sm:$0xff]  ;;  %v2100_v22 = vmov 0.0   ;;  %vm2101_vm1 = vmmov 0   ;;  %v217_v28 = vlaneseq }
  0x3b   : > { %v176_v2 = vsel %vm175_vm0, %v173_v0, inf  ;;  %v177_v3 = vsel %vm175_vm0, %v174_v1, inf  ;;  %1734 = vmatprep.subr.bf16.mxu0 %v2100_v22  ;;  %1740 = vmatprep.subr.bf16.mxu1 %v2100_v22  ;;  %vm279_vm3 = vcmask 130048   ;;  %vm274_vm4 = vcmask 125952   ;;  %s164_s3 = scalar_lea.vmem [#allocation5], %s2223_s27  ;;  %s1687_s4 = sshll.u32 %s2140_s13, 4 }
  0x3c   : > { %v178_v4 = vmin.f32 %v176_v2, %v177_v3  ;;  %1736 = vmatprep.mubr.msk.bf16.mxu0 %vm2101_vm1, %v2100_v22  ;;  %1742 = vmatprep.mubr.msk.bf16.mxu1 %vm2101_vm1, %v2100_v22  ;;  %v2241_v29 = vshrl.u32 %v217_v28, 7  ;;  %v220_v33 = vand.u32 127, %v217_v28  ;;  %vm324_vm5 = vcmask 257024   ;;  %s2424_s14 = scalar_lea.hbm %s2495_s1, %s1687_s4  ;;  %s1535_s16 = sshll.u32 %s164_s3, 4  ;;  %s1536_s16 = int_to_ptr.vmem [resolvable:$true] %s1535_s16 }
  0x3d   : > { %s1518_s17 = scalar_lea.sflag [#allocation4], %s2223_s27  ;;  %s1997_s19 = scalar_lea.vmem %s1536_s16, 16 }
  0x3e   : > { %179 = vmin.xlane.f32.xlu0 %v178_v4  ;;  %v221_v34 = vmul.u32 8, %v2241_v29  ;;  %p1998_p6 = scmp.ne.s32.totalorder %s1536_s16, %s1997_s19  ;;  %p2503_p11 = scmp.ne.s32.totalorder %s2500_s21, 0 }
  0x3f   : > { %s2102_s23 = smov [#allocation5]  }
  0x40   : > { %vm222_vm2 = vcmp.eq.s32.totalorder %v220_v33, %v221_v34  ;;  %p1999_p12 = pnand %p1998_p6, %p2503_p11  ;;  %s2001_s24 = sshll.u32 %s2102_s23, 4  ;;  %s2002_s24 = int_to_ptr.vmem [resolvable:$false] %s2001_s24 }
  0x41   : > { %v223_v39 = vsel %vm222_vm2, 1.0, %v2100_v22  ;;  %s2003_s25 = scalar_lea.vmem %s2002_s24, 32  ;;  %p2004_p8 = scmp.lt.s32.totalorder %s1536_s16, %s2002_s24 }
  0x42   : > { %v224_v40 = vpack.c.bf16 %v223_v39, %v223_v39  ;;  %p2000_p13 = pneg %p1999_p12  ;;  %p2005_p10 = scmp.lt.s32.totalorder %s2003_s25, %s1997_s19 }
  0x44   : > { %p2006_p0 = por %p2005_p10, %p2004_p8 }
  0x46   : > { %p2007_p2 = pnand %p2006_p0, %p2000_p13 }
  0xcb   : > { %v180_v5 = vpop.xlane.xlu0 %179 }
  0xcc   : > { %v181_v6 = vrot.slane %v180_v5, 4 }
  0xce   : > { %v182_v7 = vmin.f32 %v180_v5, %v181_v6 }
  0xd0   : > { %v183_v8 = vrot.slane %v182_v7, 2 }
  0xd2   : > { %v184_v9 = vmin.f32 %v182_v7, %v183_v8 }
  0xd4   : > { %v185_v10 = vrot.slane %v184_v9, 1 }
  0xd6   : > { %v186_v11 = vmin.f32 %v184_v9, %v185_v10 }
  0xd8   : > { %1860 = vpush %v186_v11 }
 0x109   : > { %s1861_s28 = spop %1860 }
 0x10a   : > { %v188_v12 = vstv %s1861_s28 }
 0x10b   : > { %v189_v13 = vsub.f32 %v173_v0, %v188_v12  ;;  %v190_v14 = vsub.f32 %v174_v1, %v188_v12 }
 0x10d   : > { %v191_v15 = vsel %vm175_vm0, %v189_v13, -inf  ;;  %v192_v16 = vsel %vm175_vm0, %v190_v14, -inf }
 0x10e   : > { %v193_v17 = vmax.f32 %v191_v15, %v192_v16 }
 0x110   : > { %194 = vmax.xlane.f32.xlu0 %v193_v17 }
 0x19d   : > { %v195_v18 = vpop.xlane.xlu0 %194 }
 0x19e   : > { %v196_v19 = vrot.slane %v195_v18, 4 }
 0x1a0   : > { %v197_v20 = vmax.f32 %v195_v18, %v196_v19 }
 0x1a2   : > { %v198_v21 = vrot.slane %v197_v20, 2 }
 0x1a4   : > { %v199_v23 = vmax.f32 %v197_v20, %v198_v21 }
 0x1a6   : > { %v200_v24 = vrot.slane %v199_v23, 1 }
 0x1a8   : > { %v201_v25 = vmax.f32 %v199_v23, %v200_v24 }
 0x1aa   : > { %1862 = vpush %v201_v25 }
 0x1db   : > { %s1863_s20 = spop %1862 }
 0x1dc   : > { %v203_v26 = vstv %s1863_s20 }
 0x1dd   : > { %1921 = vrcp.f32 %v203_v26 }
 0x1e7   : > { %v1922_v27 = vpop.eup %1921 }
 0x1e8   : > { %1864 = vpush %v1922_v27 }
 0x219   : > { %s1865_s30 = spop %1864 }
 0x21a   : > { %v206_v30 = vstv %s1865_s30 }
 0x21b   : > { %v207_v31 = vmul.f32 %v206_v30, %v189_v13  ;;  %v208_v32 = vmul.f32 %v206_v30, %v190_v14 }
 0x21d   : > { %v209_v35 = vadd.f32 1e-06, %v207_v31  ;;  %v210_v36 = vadd.f32 1e-06, %v208_v32 }
 0x21f   : > { %1923 = vlog2.f32 %v209_v35  ;;  %v215_v37 = vpack.c.bf16 %v210_v36, %v209_v35 }
 0x220   : > { %1925 = vlog2.f32 %v210_v36 }
 0x221   : > { %v2245_v38 = vsel %vm175_vm0, %v215_v37, 0 }
 0x222   : > { %1735 = vmatpush3.bf16.xpose.msra.mxu0 %v2245_v38 }
 0x223   : > { %1752 = vmatprep.subr.bf16.mxu0 %v2100_v22 }
 0x229   : > { %v1924_v41 = vpop.eup %1923  ;;  %1737 = vmatmul.mubr.msk.bf16.vlgmr.msra.gmra.mrb[0].mxu0 %vm175_vm0, %v224_v40 }
 0x22a   : > { %v1926_v42 = vpop.eup %1925  ;;  %v212_v43 = vmul.f32 0.6931472, %v1924_v41  ;;  %1754 = vmatprep.mubr.msk.bf16.mxu0 %vm2101_vm1, %v2100_v22 }
 0x22b   : > { %v214_v44 = vmul.f32 0.6931472, %v1926_v42 }
 0x22d   : > { %v2253_v45 = vpack.c.bf16 %v214_v44, %v212_v43 }
 0x22f   : > { %1741 = vmatpush3.bf16.msra.mxu1 %v2253_v45  ;;  %1753 = vmatpush3.bf16.msra.mxu0 %v2253_v45 }
 0x230   : > { %1746 = vmatprep.subr.bf16.mxu1 %v2100_v22  ;;  %1764 = vmatprep.subr.bf16.mxu0 %v2100_v22 }
 0x2fc   : > { %v265_v46 = vpop.f32.mrb[0].mxu0 }
 0x2fd   : > { %1927 = vlog2.f32 %v265_v46  ;;  %v278_v47 = vpack.c.bf16 %v265_v46, %v265_v46  ;;  %v1738_v48 = vpop.f32.mrb[1].mxu0 }
 0x2fe   : > { %v268_v49 = vpop.f32.mrb[2].mxu0 }
 0x2ff   : > { %v1739_v50 = vpop.f32.mrb[3].mxu0  ;;  %1743 = vmatmul.mubr.msk.bf16.vlgmr.msra.gmra.mrb[0].mxu1 %vm279_vm3, %v278_v47 }
 0x300   : > { %1747 = vmatpush3.bf16.xpose.msra.mxu1 %v2245_v38  ;;  %1748 = vmatprep.mubr.msk.bf16.mxu1 %vm2101_vm1, %v2100_v22 }
 0x301   : > { %1758 = vmatprep.subr.bf16.mxu1 %v2100_v22 }
 0x307   : > { %v1928_v51 = vpop.eup %1927 }
 0x308   : > { %v272_v52 = vmul.f32 0.6931472, %v1928_v51 }
 0x30a   : > { %v273_v53 = vmul.f32 %v272_v52, %v265_v46 }
 0x30c   : > { %v275_v54 = vsel %vm274_vm4, %v273_v53, 0.0 }
 0x30d   : > { %276 = vadd.xlane.f32.xlu1 %v275_v54 }
 0x39a   : > { %v277_v55 = vpop.xlane.xlu1 %276 }
 0x3d2   : > { %v317_v56 = vpop.f32.mrb[0].mxu1 }
 0x3d3   : > { %v323_v57 = vsub.f32 %v277_v55, %v317_v56  ;;  %v1744_v58 = vpop.f32.mrb[1].mxu1 }
 0x3d4   : > { %v320_v59 = vpop.f32.mrb[2].mxu1 }
 0x3d5   : > { %v325_v60 = vsel %vm324_vm5, %v323_v57, inf  ;;  %v1745_v61 = vpop.f32.mrb[3].mxu1 }
 0x3d6   : > { %v326_v62 = vrot.slane %v325_v60, 4 }
 0x3d8   : > { %v327_v63 = vmin.f32 %v325_v60, %v326_v62 }
 0x3da   : > { %v328_v0 = vrot.slane %v327_v63, 2 }
 0x3dc   : > { %v329_v1 = vmin.f32 %v327_v63, %v328_v0 }
 0x3de   : > { %v330_v2 = vrot.slane %v329_v1, 1 }
 0x3e0   : > { %v331_v3 = vmin.f32 %v329_v1, %v330_v2 }
 0x3e2   : > { %vm332_vm6 = vcmp.eq.f32.partialorder %v323_v57, %v331_v3 }
 0x3e3   : > { %v333_v4 = vsel %vm332_vm6, %v2241_v29, 4 }
 0x3e4   : > { %v334_v5 = vsel %vm324_vm5, %v333_v4, 2147483647 }
 0x3e5   : > { %v335_v6 = vrot.slane %v334_v5, 4 }
 0x3e7   : > { %vm336_vm7 = vcmp.lt.s32.totalorder %v334_v5, %v335_v6 }
 0x3e8   : > { %v337_v7 = vsel %vm336_vm7, %v334_v5, %v335_v6 }
 0x3e9   : > { %v338_v8 = vrot.slane %v337_v7, 2 }
 0x3eb   : > { %vm339_vm8 = vcmp.lt.s32.totalorder %v337_v7, %v338_v8 }
 0x3ec   : > { %v340_v9 = vsel %vm339_vm8, %v337_v7, %v338_v8 }
 0x3ed   : > { %v341_v10 = vrot.slane %v340_v9, 1 }
 0x3ef   : > { %vm342_vm9 = vcmp.lt.s32.totalorder %v340_v9, %v341_v10 }
 0x3f0   : > { %v343_v11 = vsel %vm342_vm9, %v340_v9, %v341_v10 }
 0x3f1   : > { %vm344_vm10 = vcmp.eq.s32.totalorder %v2241_v29, %v343_v11 }
 0x3f2   : > { %v1657_v12 = vsel %vm344_vm10, 1.0, %v2100_v22 }
 0x3f3   : > { %v347_v13 = vmax.f32 %v1657_v12, 0.0 }
 0x3f5   : > { %v392_v14 = vsel %vm324_vm5, %v347_v13, 0.0  ;;  %v348_v15 = vpack.c.bf16 %v347_v13, %v347_v13 }
 0x3f6   : > { %393 = vadd.xlane.f32.xlu1 %v392_v14 }
 0x3f7   : > { %1749 = vmatmul.mubr.msk.bf16.vlgmr.msra.gmra.mrb[4].mxu1 %vm175_vm0, %v348_v15 }
 0x3f8   : > { %1759 = vmatpush3.bf16.xpose.msra.mxu1 %v2245_v38  ;;  %1760 = vmatprep.mubr.msk.bf16.mxu1 %vm2101_vm1, %v2100_v22 }
 0x3f9   : > { %1770 = vmatprep.subr.bf16.mxu1 %v2100_v22 }
 0x483   : > { %v394_v16 = vpop.xlane.xlu1 %393 }
 0x484   : > { %v395_v17 = vadd.f32 1e-06, %v394_v16 }
 0x486   : > { %1929 = vrcp.f32 %v395_v17 }
 0x490   : > { %v1930_v18 = vpop.eup %1929 }
 0x4ca   : > { %v386_v19 = vpop.f32.mrb[4].mxu1 }
 0x4cb   : > { %v397_v20 = vmul.f32 %v1930_v18, %v386_v19  ;;  %v1750_v21 = vpop.f32.mrb[5].mxu1 }
 0x4cc   : > { %v389_v23 = vpop.f32.mrb[6].mxu1 }
 0x4cd   : > { %1931 = vlog2.f32 %v397_v20  ;;  %v404_v24 = vpack.c.bf16 %v397_v20, %v397_v20  ;;  %v1751_v25 = vpop.f32.mrb[7].mxu1 }
 0x4cf   : > { %1755 = vmatmul.mubr.msk.bf16.vlgmr.msra.gmra.mrb[4].mxu0 %vm279_vm3, %v404_v24 }
 0x4d0   : > { %1765 = vmatpush3.bf16.msra.mxu0 %v2253_v45  ;;  %1766 = vmatprep.mubr.msk.bf16.mxu0 %vm2101_vm1, %v2100_v22 }
 0x4d1   : > { %1776 = vmatprep.subr.bf16.mxu0 %v2100_v22 }
 0x4d7   : > { %v1932_v26 = vpop.eup %1931 }
 0x4d8   : > { %v399_v27 = vmul.f32 0.6931472, %v1932_v26 }
 0x4da   : > { %v400_v28 = vmul.f32 %v399_v27, %v397_v20 }
 0x4dc   : > { %v401_v30 = vsel %vm274_vm4, %v400_v28, 0.0 }
 0x4dd   : > { %402 = vadd.xlane.f32.xlu0 %v401_v30 }
 0x56a   : > { %v403_v31 = vpop.xlane.xlu0 %402 }
 0x5a2   : > { %v442_v32 = vpop.f32.mrb[4].mxu0 }
 0x5a3   : > { %v448_v33 = vsub.f32 %v403_v31, %v442_v32  ;;  %v1756_v34 = vpop.f32.mrb[5].mxu0 }
 0x5a4   : > { %v445_v35 = vpop.f32.mrb[6].mxu0 }
 0x5a5   : > { %v449_v36 = vsel %vm324_vm5, %v448_v33, inf  ;;  %v1757_v37 = vpop.f32.mrb[7].mxu0 }
 0x5a6   : > { %v450_v39 = vrot.slane %v449_v36, 4 }
 0x5a8   : > { %v451_v40 = vmin.f32 %v449_v36, %v450_v39 }
 0x5aa   : > { %v452_v41 = vrot.slane %v451_v40, 2 }
 0x5ac   : > { %v453_v42 = vmin.f32 %v451_v40, %v452_v41 }
 0x5ae   : > { %v454_v43 = vrot.slane %v453_v42, 1 }
 0x5b0   : > { %v455_v44 = vmin.f32 %v453_v42, %v454_v43 }
 0x5b2   : > { %vm456_vm11 = vcmp.eq.f32.partialorder %v448_v33, %v455_v44 }
 0x5b3   : > { %v457_v46 = vsel %vm456_vm11, %v2241_v29, 4 }
 0x5b4   : > { %v458_v47 = vsel %vm324_vm5, %v457_v46, 2147483647 }
 0x5b5   : > { %v459_v48 = vrot.slane %v458_v47, 4 }
 0x5b7   : > { %vm460_vm12 = vcmp.lt.s32.totalorder %v458_v47, %v459_v48 }
 0x5b8   : > { %v461_v49 = vsel %vm460_vm12, %v458_v47, %v459_v48 }
 0x5b9   : > { %v462_v50 = vrot.slane %v461_v49, 2 }
 0x5bb   : > { %vm463_vm13 = vcmp.lt.s32.totalorder %v461_v49, %v462_v50 }
 0x5bc   : > { %v464_v51 = vsel %vm463_vm13, %v461_v49, %v462_v50 }
 0x5bd   : > { %v465_v52 = vrot.slane %v464_v51, 1 }
 0x5bf   : > { %vm466_vm14 = vcmp.lt.s32.totalorder %v464_v51, %v465_v52 }
 0x5c0   : > { %v467_v53 = vsel %vm466_vm14, %v464_v51, %v465_v52 }
 0x5c1   : > { %vm468_vm15 = vcmp.eq.s32.totalorder %v2241_v29, %v467_v53 }
 0x5c2   : > { %v1660_v54 = vsel %vm468_vm15, 1.0, %v2100_v22 }
 0x5c3   : > { %v471_v55 = vmax.f32 %v347_v13, %v1660_v54 }
 0x5c5   : > { %v516_v56 = vsel %vm324_vm5, %v471_v55, 0.0  ;;  %v472_v57 = vpack.c.bf16 %v471_v55, %v471_v55 }
 0x5c6   : > { %517 = vadd.xlane.f32.xlu1 %v516_v56 }
 0x5c7   : > { %1761 = vmatmul.mubr.msk.bf16.vlgmr.msra.gmra.mrb[8].mxu1 %vm175_vm0, %v472_v57 }
 0x5c8   : > { %1771 = vmatpush3.bf16.xpose.msra.mxu1 %v2245_v38  ;;  %1772 = vmatprep.mubr.msk.bf16.mxu1 %vm2101_vm1, %v2100_v22 }
 0x5c9   : > { %1782 = vmatprep.subr.bf16.mxu1 %v2100_v22 }
 0x653   : > { %v518_v58 = vpop.xlane.xlu1 %517 }
 0x654   : > { %v519_v59 = vadd.f32 1e-06, %v518_v58 }
 0x656   : > { %1933 = vrcp.f32 %v519_v59 }
 0x660   : > { %v1934_v60 = vpop.eup %1933 }
 0x69a   : > { %v510_v61 = vpop.f32.mrb[8].mxu1 }
 0x69b   : > { %v521_v62 = vmul.f32 %v1934_v60, %v510_v61  ;;  %v1762_v63 = vpop.f32.mrb[9].mxu1 }
 0x69c   : > { %v513_v0 = vpop.f32.mrb[10].mxu1 }
 0x69d   : > { %1935 = vlog2.f32 %v521_v62  ;;  %v528_v1 = vpack.c.bf16 %v521_v62, %v521_v62  ;;  %v1763_v2 = vpop.f32.mrb[11].mxu1 }
 0x69f   : > { %1767 = vmatmul.mubr.msk.bf16.vlgmr.msra.gmra.mrb[8].mxu0 %vm279_vm3, %v528_v1 }
 0x6a0   : > { %1777 = vmatpush3.bf16.msra.mxu0 %v2253_v45  ;;  %1778 = vmatprep.mubr.msk.bf16.mxu0 %vm2101_vm1, %v2100_v22 }
 0x6a1   : > { %1788 = vmatprep.subr.bf16.mxu0 %v2100_v22 }
 0x6a7   : > { %v1936_v3 = vpop.eup %1935 }
 0x6a8   : > { %v523_v4 = vmul.f32 0.6931472, %v1936_v3 }
 0x6aa   : > { %v524_v5 = vmul.f32 %v523_v4, %v521_v62 }
 0x6ac   : > { %v525_v6 = vsel %vm274_vm4, %v524_v5, 0.0 }
 0x6ad   : > { %526 = vadd.xlane.f32.xlu0 %v525_v6 }
 0x73a   : > { %v527_v7 = vpop.xlane.xlu0 %526 }
 0x772   : > { %v566_v8 = vpop.f32.mrb[8].mxu0 }
 0x773   : > { %v572_v9 = vsub.f32 %v527_v7, %v566_v8  ;;  %v1768_v10 = vpop.f32.mrb[9].mxu0 }
 0x774   : > { %v569_v11 = vpop.f32.mrb[10].mxu0 }
 0x775   : > { %v573_v12 = vsel %vm324_vm5, %v572_v9, inf  ;;  %v1769_v13 = vpop.f32.mrb[11].mxu0 }
 0x776   : > { %v574_v14 = vrot.slane %v573_v12, 4 }
 0x778   : > { %v575_v15 = vmin.f32 %v573_v12, %v574_v14 }
 0x77a   : > { %v576_v16 = vrot.slane %v575_v15, 2 }
 0x77c   : > { %v577_v17 = vmin.f32 %v575_v15, %v576_v16 }
 0x77e   : > { %v578_v18 = vrot.slane %v577_v17, 1 }
 0x780   : > { %v579_v19 = vmin.f32 %v577_v17, %v578_v18 }
 0x782   : > { %vm580_vm2 = vcmp.eq.f32.partialorder %v572_v9, %v579_v19 }
 0x783   : > { %v581_v20 = vsel %vm580_vm2, %v2241_v29, 4 }
 0x784   : > { %v582_v21 = vsel %vm324_vm5, %v581_v20, 2147483647 }
 0x785   : > { %v583_v23 = vrot.slane %v582_v21, 4 }
 0x787   : > { %vm584_vm6 = vcmp.lt.s32.totalorder %v582_v21, %v583_v23 }
 0x788   : > { %v585_v24 = vsel %vm584_vm6, %v582_v21, %v583_v23 }
 0x789   : > { %v586_v25 = vrot.slane %v585_v24, 2 }
 0x78b   : > { %vm587_vm7 = vcmp.lt.s32.totalorder %v585_v24, %v586_v25 }
 0x78c   : > { %v588_v26 = vsel %vm587_vm7, %v585_v24, %v586_v25 }
 0x78d   : > { %v589_v27 = vrot.slane %v588_v26, 1 }
 0x78f   : > { %vm590_vm8 = vcmp.lt.s32.totalorder %v588_v26, %v589_v27 }
 0x790   : > { %v591_v28 = vsel %vm590_vm8, %v588_v26, %v589_v27 }
 0x791   : > { %vm592_vm9 = vcmp.eq.s32.totalorder %v2241_v29, %v591_v28 }
 0x792   : > { %v1663_v30 = vsel %vm592_vm9, 1.0, %v2100_v22 }
 0x793   : > { %v595_v31 = vmax.f32 %v471_v55, %v1663_v30 }
 0x795   : > { %v640_v32 = vsel %vm324_vm5, %v595_v31, 0.0  ;;  %v596_v33 = vpack.c.bf16 %v595_v31, %v595_v31 }
 0x796   : > { %641 = vadd.xlane.f32.xlu1 %v640_v32 }
 0x797   : > { %1773 = vmatmul.mubr.msk.bf16.vlgmr.msra.gmra.mrb[12].mxu1 %vm175_vm0, %v596_v33 }
 0x798   : > { %1783 = vmatpush3.bf16.xpose.msra.mxu1 %v2245_v38  ;;  %1784 = vmatprep.mubr.msk.bf16.mxu1 %vm2101_vm1, %v2100_v22 }
 0x799   : > { %1794 = vmatprep.subr.bf16.mxu1 %v2100_v22 }
 0x823   : > { %v642_v34 = vpop.xlane.xlu1 %641 }
 0x824   : > { %v643_v35 = vadd.f32 1e-06, %v642_v34 }
 0x826   : > { %1937 = vrcp.f32 %v643_v35 }
 0x830   : > { %v1938_v36 = vpop.eup %1937 }
 0x86a   : > { %v634_v37 = vpop.f32.mrb[12].mxu1 }
 0x86b   : > { %v645_v39 = vmul.f32 %v1938_v36, %v634_v37  ;;  %v1774_v40 = vpop.f32.mrb[13].mxu1 }
 0x86c   : > { %v637_v41 = vpop.f32.mrb[14].mxu1 }
 0x86d   : > { %1939 = vlog2.f32 %v645_v39  ;;  %v652_v42 = vpack.c.bf16 %v645_v39, %v645_v39  ;;  %v1775_v43 = vpop.f32.mrb[15].mxu1 }
 0x86f   : > { %1779 = vmatmul.mubr.msk.bf16.vlgmr.msra.gmra.mrb[12].mxu0 %vm279_vm3, %v652_v42 }
 0x870   : > { %1789 = vmatpush3.bf16.msra.mxu0 %v2253_v45  ;;  %1790 = vmatprep.mubr.msk.bf16.mxu0 %vm2101_vm1, %v2100_v22 }
 0x871   : > { %1800 = vmatprep.subr.bf16.mxu0 %v2100_v22 }
 0x877   : > { %v1940_v44 = vpop.eup %1939 }
 0x878   : > { %v647_v46 = vmul.f32 0.6931472, %v1940_v44 }
 0x87a   : > { %v648_v47 = vmul.f32 %v647_v46, %v645_v39 }
 0x87c   : > { %v649_v48 = vsel %vm274_vm4, %v648_v47, 0.0 }
 0x87d   : > { %650 = vadd.xlane.f32.xlu0 %v649_v48 }
 0x90a   : > { %v651_v49 = vpop.xlane.xlu0 %650 }
 0x942   : > { %v690_v50 = vpop.f32.mrb[12].mxu0 }
 0x943   : > { %v696_v51 = vsub.f32 %v651_v49, %v690_v50  ;;  %v1780_v52 = vpop.f32.mrb[13].mxu0 }
 0x944   : > { %v693_v53 = vpop.f32.mrb[14].mxu0 }
 0x945   : > { %v697_v54 = vsel %vm324_vm5, %v696_v51, inf  ;;  %v1781_v55 = vpop.f32.mrb[15].mxu0 }
 0x946   : > { %v698_v56 = vrot.slane %v697_v54, 4 }
 0x948   : > { %v699_v57 = vmin.f32 %v697_v54, %v698_v56 }
 0x94a   : > { %v700_v58 = vrot.slane %v699_v57, 2 }
 0x94c   : > { %v701_v59 = vmin.f32 %v699_v57, %v700_v58 }
 0x94e   : > { %v702_v60 = vrot.slane %v701_v59, 1 }
 0x950   : > { %v703_v61 = vmin.f32 %v701_v59, %v702_v60 }
 0x952   : > { %vm704_vm10 = vcmp.eq.f32.partialorder %v696_v51, %v703_v61 }
 0x953   : > { %v705_v62 = vsel %vm704_vm10, %v2241_v29, 4 }
 0x954   : > { %v706_v63 = vsel %vm324_vm5, %v705_v62, 2147483647 }
 0x955   : > { %v707_v0 = vrot.slane %v706_v63, 4 }
 0x957   : > { %vm708_vm11 = vcmp.lt.s32.totalorder %v706_v63, %v707_v0 }
 0x958   : > { %v709_v1 = vsel %vm708_vm11, %v706_v63, %v707_v0 }
 0x959   : > { %v710_v2 = vrot.slane %v709_v1, 2 }
 0x95b   : > { %vm711_vm12 = vcmp.lt.s32.totalorder %v709_v1, %v710_v2 }
 0x95c   : > { %v712_v3 = vsel %vm711_vm12, %v709_v1, %v710_v2 }
 0x95d   : > { %v713_v4 = vrot.slane %v712_v3, 1 }
 0x95f   : > { %vm714_vm13 = vcmp.lt.s32.totalorder %v712_v3, %v713_v4 }
 0x960   : > { %v715_v5 = vsel %vm714_vm13, %v712_v3, %v713_v4 }
 0x961   : > { %vm716_vm14 = vcmp.eq.s32.totalorder %v2241_v29, %v715_v5 }
 0x962   : > { %v1666_v6 = vsel %vm716_vm14, 1.0, %v2100_v22 }
 0x963   : > { %v719_v7 = vmax.f32 %v595_v31, %v1666_v6 }
 0x965   : > { %v764_v8 = vsel %vm324_vm5, %v719_v7, 0.0  ;;  %v720_v9 = vpack.c.bf16 %v719_v7, %v719_v7 }
 0x966   : > { %765 = vadd.xlane.f32.xlu1 %v764_v8 }
 0x967   : > { %1785 = vmatmul.mubr.msk.bf16.vlgmr.msra.gmra.mrb[16].mxu1 %vm175_vm0, %v720_v9 }
 0x968   : > { %1795 = vmatpush3.bf16.xpose.msra.mxu1 %v2245_v38  ;;  %1796 = vmatprep.mubr.msk.bf16.mxu1 %vm2101_vm1, %v2100_v22 }
 0x969   : > { %1806 = vmatprep.subr.bf16.mxu1 %v2100_v22 }
 0x9f3   : > { %v766_v10 = vpop.xlane.xlu1 %765 }
 0x9f4   : > { %v767_v11 = vadd.f32 1e-06, %v766_v10 }
 0x9f6   : > { %1941 = vrcp.f32 %v767_v11 }
 0xa00   : > { %v1942_v12 = vpop.eup %1941 }
 0xa3a   : > { %v758_v13 = vpop.f32.mrb[16].mxu1 }
 0xa3b   : > { %v769_v14 = vmul.f32 %v1942_v12, %v758_v13  ;;  %v1786_v15 = vpop.f32.mrb[17].mxu1 }
 0xa3c   : > { %v761_v16 = vpop.f32.mrb[18].mxu1 }
 0xa3d   : > { %1943 = vlog2.f32 %v769_v14  ;;  %v776_v17 = vpack.c.bf16 %v769_v14, %v769_v14  ;;  %v1787_v18 = vpop.f32.mrb[19].mxu1 }
 0xa3f   : > { %1791 = vmatmul.mubr.msk.bf16.vlgmr.msra.gmra.mrb[16].mxu0 %vm279_vm3, %v776_v17 }
 0xa40   : > { %1801 = vmatpush3.bf16.msra.mxu0 %v2253_v45  ;;  %1802 = vmatprep.mubr.msk.bf16.mxu0 %vm2101_vm1, %v2100_v22 }
 0xa41   : > { %1812 = vmatprep.subr.bf16.mxu0 %v2100_v22 }
 0xa47   : > { %v1944_v19 = vpop.eup %1943 }
 0xa48   : > { %v771_v20 = vmul.f32 0.6931472, %v1944_v19 }
 0xa4a   : > { %v772_v21 = vmul.f32 %v771_v20, %v769_v14 }
 0xa4c   : > { %v773_v23 = vsel %vm274_vm4, %v772_v21, 0.0 }
 0xa4d   : > { %774 = vadd.xlane.f32.xlu0 %v773_v23 }
 0xada   : > { %v775_v24 = vpop.xlane.xlu0 %774 }
 0xb12   : > { %v814_v25 = vpop.f32.mrb[16].mxu0 }
 0xb13   : > { %v820_v26 = vsub.f32 %v775_v24, %v814_v25  ;;  %v1792_v27 = vpop.f32.mrb[17].mxu0 }
 0xb14   : > { %v817_v28 = vpop.f32.mrb[18].mxu0 }
 0xb15   : > { %v821_v30 = vsel %vm324_vm5, %v820_v26, inf  ;;  %v1793_v31 = vpop.f32.mrb[19].mxu0 }
 0xb16   : > { %v822_v32 = vrot.slane %v821_v30, 4 }
 0xb18   : > { %v823_v33 = vmin.f32 %v821_v30, %v822_v32 }
 0xb1a   : > { %v824_v34 = vrot.slane %v823_v33, 2 }
 0xb1c   : > { %v825_v35 = vmin.f32 %v823_v33, %v824_v34 }
 0xb1e   : > { %v826_v36 = vrot.slane %v825_v35, 1 }
 0xb20   : > { %v827_v37 = vmin.f32 %v825_v35, %v826_v36 }
 0xb22   : > { %vm828_vm15 = vcmp.eq.f32.partialorder %v820_v26, %v827_v37 }
 0xb23   : > { %v829_v39 = vsel %vm828_vm15, %v2241_v29, 4 }
 0xb24   : > { %v830_v40 = vsel %vm324_vm5, %v829_v39, 2147483647 }
 0xb25   : > { %v831_v41 = vrot.slane %v830_v40, 4 }
 0xb27   : > { %vm832_vm2 = vcmp.lt.s32.totalorder %v830_v40, %v831_v41 }
 0xb28   : > { %v833_v42 = vsel %vm832_vm2, %v830_v40, %v831_v41 }
 0xb29   : > { %v834_v43 = vrot.slane %v833_v42, 2 }
 0xb2b   : > { %vm835_vm6 = vcmp.lt.s32.totalorder %v833_v42, %v834_v43 }
 0xb2c   : > { %v836_v44 = vsel %vm835_vm6, %v833_v42, %v834_v43 }
 0xb2d   : > { %v837_v46 = vrot.slane %v836_v44, 1 }
 0xb2f   : > { %vm838_vm7 = vcmp.lt.s32.totalorder %v836_v44, %v837_v46 }
 0xb30   : > { %v839_v47 = vsel %vm838_vm7, %v836_v44, %v837_v46 }
 0xb31   : > { %vm840_vm8 = vcmp.eq.s32.totalorder %v2241_v29, %v839_v47 }
 0xb32   : > { %v1669_v48 = vsel %vm840_vm8, 1.0, %v2100_v22 }
 0xb33   : > { %v843_v49 = vmax.f32 %v719_v7, %v1669_v48 }
 0xb35   : > { %v888_v50 = vsel %vm324_vm5, %v843_v49, 0.0  ;;  %v844_v51 = vpack.c.bf16 %v843_v49, %v843_v49 }
 0xb36   : > { %889 = vadd.xlane.f32.xlu1 %v888_v50 }
 0xb37   : > { %1797 = vmatmul.mubr.msk.bf16.vlgmr.msra.gmra.mrb[20].mxu1 %vm175_vm0, %v844_v51 }
 0xb38   : > { %1807 = vmatpush3.bf16.xpose.msra.mxu1 %v2245_v38  ;;  %1808 = vmatprep.mubr.msk.bf16.mxu1 %vm2101_vm1, %v2100_v22 }
 0xb39   : > { %1818 = vmatprep.subr.bf16.mxu1 %v2100_v22 }
 0xbc3   : > { %v890_v52 = vpop.xlane.xlu1 %889 }
 0xbc4   : > { %v891_v53 = vadd.f32 1e-06, %v890_v52 }
 0xbc6   : > { %1945 = vrcp.f32 %v891_v53 }
 0xbd0   : > { %v1946_v54 = vpop.eup %1945 }
 0xc0a   : > { %v882_v55 = vpop.f32.mrb[20].mxu1 }
 0xc0b   : > { %v893_v56 = vmul.f32 %v1946_v54, %v882_v55  ;;  %v1798_v57 = vpop.f32.mrb[21].mxu1 }
 0xc0c   : > { %v885_v58 = vpop.f32.mrb[22].mxu1 }
 0xc0d   : > { %1947 = vlog2.f32 %v893_v56  ;;  %v900_v59 = vpack.c.bf16 %v893_v56, %v893_v56  ;;  %v1799_v60 = vpop.f32.mrb[23].mxu1 }
 0xc0f   : > { %1803 = vmatmul.mubr.msk.bf16.vlgmr.msra.gmra.mrb[20].mxu0 %vm279_vm3, %v900_v59 }
 0xc10   : > { %1813 = vmatpush3.bf16.msra.mxu0 %v2253_v45  ;;  %1814 = vmatprep.mubr.msk.bf16.mxu0 %vm2101_vm1, %v2100_v22 }
 0xc11   : > { %1824 = vmatprep.subr.bf16.mxu0 %v2100_v22 }
 0xc17   : > { %v1948_v61 = vpop.eup %1947 }
 0xc18   : > { %v895_v62 = vmul.f32 0.6931472, %v1948_v61 }
 0xc1a   : > { %v896_v63 = vmul.f32 %v895_v62, %v893_v56 }
 0xc1c   : > { %v897_v0 = vsel %vm274_vm4, %v896_v63, 0.0 }
 0xc1d   : > { %898 = vadd.xlane.f32.xlu0 %v897_v0 }
 0xcaa   : > { %v899_v1 = vpop.xlane.xlu0 %898 }
 0xce2   : > { %v938_v2 = vpop.f32.mrb[20].mxu0 }
 0xce3   : > { %v944_v3 = vsub.f32 %v899_v1, %v938_v2  ;;  %v1804_v4 = vpop.f32.mrb[21].mxu0 }
 0xce4   : > { %v941_v5 = vpop.f32.mrb[22].mxu0 }
 0xce5   : > { %v945_v6 = vsel %vm324_vm5, %v944_v3, inf  ;;  %v1805_v7 = vpop.f32.mrb[23].mxu0 }
 0xce6   : > { %v946_v8 = vrot.slane %v945_v6, 4 }
 0xce8   : > { %v947_v9 = vmin.f32 %v945_v6, %v946_v8 }
 0xcea   : > { %v948_v10 = vrot.slane %v947_v9, 2 }
 0xcec   : > { %v949_v11 = vmin.f32 %v947_v9, %v948_v10 }
 0xcee   : > { %v950_v12 = vrot.slane %v949_v11, 1 }
 0xcf0   : > { %v951_v13 = vmin.f32 %v949_v11, %v950_v12 }
 0xcf2   : > { %vm952_vm9 = vcmp.eq.f32.partialorder %v944_v3, %v951_v13 }
 0xcf3   : > { %v953_v14 = vsel %vm952_vm9, %v2241_v29, 4 }
 0xcf4   : > { %v954_v15 = vsel %vm324_vm5, %v953_v14, 2147483647 }
 0xcf5   : > { %v955_v16 = vrot.slane %v954_v15, 4 }
 0xcf7   : > { %vm956_vm10 = vcmp.lt.s32.totalorder %v954_v15, %v955_v16 }
 0xcf8   : > { %v957_v17 = vsel %vm956_vm10, %v954_v15, %v955_v16 }
 0xcf9   : > { %v958_v18 = vrot.slane %v957_v17, 2 }
 0xcfb   : > { %vm959_vm11 = vcmp.lt.s32.totalorder %v957_v17, %v958_v18 }
 0xcfc   : > { %v960_v19 = vsel %vm959_vm11, %v957_v17, %v958_v18 }
 0xcfd   : > { %v961_v20 = vrot.slane %v960_v19, 1 }
 0xcff   : > { %vm962_vm12 = vcmp.lt.s32.totalorder %v960_v19, %v961_v20 }
 0xd00   : > { %v963_v21 = vsel %vm962_vm12, %v960_v19, %v961_v20 }
 0xd01   : > { %vm964_vm13 = vcmp.eq.s32.totalorder %v2241_v29, %v963_v21 }
 0xd02   : > { %v1672_v23 = vsel %vm964_vm13, 1.0, %v2100_v22 }
 0xd03   : > { %v967_v24 = vmax.f32 %v843_v49, %v1672_v23 }
 0xd05   : > { %v1012_v25 = vsel %vm324_vm5, %v967_v24, 0.0  ;;  %v968_v26 = vpack.c.bf16 %v967_v24, %v967_v24 }
 0xd06   : > { %1013 = vadd.xlane.f32.xlu1 %v1012_v25 }
 0xd07   : > { %1809 = vmatmul.mubr.msk.bf16.vlgmr.msra.gmra.mrb[24].mxu1 %vm175_vm0, %v968_v26 }
 0xd08   : > { %1819 = vmatpush3.bf16.xpose.msra.mxu1 %v2245_v38  ;;  %1820 = vmatprep.mubr.msk.bf16.mxu1 %vm2101_vm1, %v2100_v22 }
 0xd09   : > { %1830 = vmatprep.subr.bf16.mxu1 %v2100_v22 }
 0xd93   : > { %v1014_v27 = vpop.xlane.xlu1 %1013 }
 0xd94   : > { %v1015_v28 = vadd.f32 1e-06, %v1014_v27 }
 0xd96   : > { %1949 = vrcp.f32 %v1015_v28 }
 0xda0   : > { %v1950_v30 = vpop.eup %1949 }
 0xdda   : > { %v1006_v31 = vpop.f32.mrb[24].mxu1 }
 0xddb   : > { %v1017_v32 = vmul.f32 %v1950_v30, %v1006_v31  ;;  %v1810_v33 = vpop.f32.mrb[25].mxu1 }
 0xddc   : > { %v1009_v34 = vpop.f32.mrb[26].mxu1 }
 0xddd   : > { %1951 = vlog2.f32 %v1017_v32  ;;  %v1024_v35 = vpack.c.bf16 %v1017_v32, %v1017_v32  ;;  %v1811_v36 = vpop.f32.mrb[27].mxu1 }
 0xddf   : > { %1815 = vmatmul.mubr.msk.bf16.vlgmr.msra.gmra.mrb[24].mxu0 %vm279_vm3, %v1024_v35 }
 0xde0   : > { %1825 = vmatpush3.bf16.msra.mxu0 %v2253_v45  ;;  %1826 = vmatprep.mubr.msk.bf16.mxu0 %vm2101_vm1, %v2100_v22 }
 0xde1   : > { %1836 = vmatprep.subr.bf16.mxu0 %v2100_v22 }
 0xde7   : > { %v1952_v37 = vpop.eup %1951 }
 0xde8   : > { %v1019_v39 = vmul.f32 0.6931472, %v1952_v37 }
 0xdea   : > { %v1020_v40 = vmul.f32 %v1019_v39, %v1017_v32 }
 0xdec   : > { %v1021_v41 = vsel %vm274_vm4, %v1020_v40, 0.0 }
 0xded   : > { %1022 = vadd.xlane.f32.xlu0 %v1021_v41 }
 0xe7a   : > { %v1023_v42 = vpop.xlane.xlu0 %1022 }
 0xeb2   : > { %v1062_v43 = vpop.f32.mrb[24].mxu0 }
 0xeb3   : > { %v1068_v44 = vsub.f32 %v1023_v42, %v1062_v43  ;;  %v1816_v46 = vpop.f32.mrb[25].mxu0 }
 0xeb4   : > { %v1065_v47 = vpop.f32.mrb[26].mxu0 }
 0xeb5   : > { %v1069_v48 = vsel %vm324_vm5, %v1068_v44, inf  ;;  %v1817_v49 = vpop.f32.mrb[27].mxu0 }
 0xeb6   : > { %v1070_v50 = vrot.slane %v1069_v48, 4 }
 0xeb8   : > { %v1071_v51 = vmin.f32 %v1069_v48, %v1070_v50 }
 0xeba   : > { %v1072_v52 = vrot.slane %v1071_v51, 2 }
 0xebc   : > { %v1073_v53 = vmin.f32 %v1071_v51, %v1072_v52 }
 0xebe   : > { %v1074_v54 = vrot.slane %v1073_v53, 1 }
 0xec0   : > { %v1075_v55 = vmin.f32 %v1073_v53, %v1074_v54 }
 0xec2   : > { %vm1076_vm14 = vcmp.eq.f32.partialorder %v1068_v44, %v1075_v55 }
 0xec3   : > { %v1077_v56 = vsel %vm1076_vm14, %v2241_v29, 4 }
 0xec4   : > { %v1078_v57 = vsel %vm324_vm5, %v1077_v56, 2147483647 }
 0xec5   : > { %v1079_v58 = vrot.slane %v1078_v57, 4 }
 0xec7   : > { %vm1080_vm15 = vcmp.lt.s32.totalorder %v1078_v57, %v1079_v58 }
 0xec8   : > { %v1081_v59 = vsel %vm1080_vm15, %v1078_v57, %v1079_v58 }
 0xec9   : > { %v1082_v60 = vrot.slane %v1081_v59, 2 }
 0xecb   : > { %vm1083_vm2 = vcmp.lt.s32.totalorder %v1081_v59, %v1082_v60 }
 0xecc   : > { %v1084_v61 = vsel %vm1083_vm2, %v1081_v59, %v1082_v60 }
 0xecd   : > { %v1085_v62 = vrot.slane %v1084_v61, 1 }
 0xecf   : > { %vm1086_vm6 = vcmp.lt.s32.totalorder %v1084_v61, %v1085_v62 }
 0xed0   : > { %v1087_v63 = vsel %vm1086_vm6, %v1084_v61, %v1085_v62 }
 0xed1   : > { %vm1088_vm7 = vcmp.eq.s32.totalorder %v2241_v29, %v1087_v63 }
 0xed2   : > { %v1675_v0 = vsel %vm1088_vm7, 1.0, %v2100_v22 }
 0xed3   : > { %v1091_v1 = vmax.f32 %v967_v24, %v1675_v0 }
 0xed5   : > { %v1136_v2 = vsel %vm324_vm5, %v1091_v1, 0.0  ;;  %v1092_v3 = vpack.c.bf16 %v1091_v1, %v1091_v1 }
 0xed6   : > { %1137 = vadd.xlane.f32.xlu1 %v1136_v2 }
 0xed7   : > { %1821 = vmatmul.mubr.msk.bf16.vlgmr.msra.gmra.mrb[28].mxu1 %vm175_vm0, %v1092_v3 }
 0xed8   : > { %1831 = vmatpush3.bf16.xpose.msra.mxu1 %v2245_v38  ;;  %1832 = vmatprep.mubr.msk.bf16.mxu1 %vm2101_vm1, %v2100_v22 }
 0xed9   : > { %1842 = vmatprep.subr.bf16.mxu1 %v2100_v22 }
 0xf63   : > { %v1138_v4 = vpop.xlane.xlu1 %1137 }
 0xf64   : > { %v1139_v5 = vadd.f32 1e-06, %v1138_v4 }
 0xf66   : > { %1953 = vrcp.f32 %v1139_v5 }
 0xf70   : > { %v1954_v6 = vpop.eup %1953 }
 0xfaa   : > { %v1130_v7 = vpop.f32.mrb[28].mxu1 }
 0xfab   : > { %v1141_v8 = vmul.f32 %v1954_v6, %v1130_v7  ;;  %v1822_v9 = vpop.f32.mrb[29].mxu1 }
 0xfac   : > { %v1133_v10 = vpop.f32.mrb[30].mxu1 }
 0xfad   : > { %1955 = vlog2.f32 %v1141_v8  ;;  %v1148_v11 = vpack.c.bf16 %v1141_v8, %v1141_v8  ;;  %v1823_v12 = vpop.f32.mrb[31].mxu1 }
 0xfaf   : > { %1827 = vmatmul.mubr.msk.bf16.vlgmr.msra.gmra.mrb[28].mxu0 %vm279_vm3, %v1148_v11 }
 0xfb0   : > { %1837 = vmatpush3.bf16.msra.mxu0 %v2253_v45  ;;  %1838 = vmatprep.mubr.msk.bf16.mxu0 %vm2101_vm1, %v2100_v22 }
 0xfb1   : > { %1848 = vmatprep.subr.bf16.mxu0 %v2100_v22 }
 0xfb7   : > { %v1956_v13 = vpop.eup %1955 }
 0xfb8   : > { %v1143_v14 = vmul.f32 0.6931472, %v1956_v13 }
 0xfba   : > { %v1144_v15 = vmul.f32 %v1143_v14, %v1141_v8 }
 0xfbc   : > { %v1145_v16 = vsel %vm274_vm4, %v1144_v15, 0.0 }
 0xfbd   : > { %1146 = vadd.xlane.f32.xlu0 %v1145_v16 }
0x104a   : > { %v1147_v17 = vpop.xlane.xlu0 %1146 }
0x1082   : > { %v1186_v18 = vpop.f32.mrb[28].mxu0 }
0x1083   : > { %v1192_v19 = vsub.f32 %v1147_v17, %v1186_v18  ;;  %v1828_v20 = vpop.f32.mrb[29].mxu0 }
0x1084   : > { %v1189_v21 = vpop.f32.mrb[30].mxu0 }
0x1085   : > { %v1193_v23 = vsel %vm324_vm5, %v1192_v19, inf  ;;  %v1829_v24 = vpop.f32.mrb[31].mxu0 }
0x1086   : > { %v1194_v25 = vrot.slane %v1193_v23, 4 }
0x1088   : > { %v1195_v26 = vmin.f32 %v1193_v23, %v1194_v25 }
0x108a   : > { %v1196_v27 = vrot.slane %v1195_v26, 2 }
0x108c   : > { %v1197_v28 = vmin.f32 %v1195_v26, %v1196_v27 }
0x108e   : > { %v1198_v30 = vrot.slane %v1197_v28, 1 }
0x1090   : > { %v1199_v31 = vmin.f32 %v1197_v28, %v1198_v30 }
0x1092   : > { %vm1200_vm8 = vcmp.eq.f32.partialorder %v1192_v19, %v1199_v31 }
0x1093   : > { %v1201_v32 = vsel %vm1200_vm8, %v2241_v29, 4  ;;  %vm1514_vm8 = vcmask 253952  }
0x1094   : > { %v1202_v33 = vsel %vm324_vm5, %v1201_v32, 2147483647 }
0x1095   : > { %v1203_v34 = vrot.slane %v1202_v33, 4 }
0x1097   : > { %vm1204_vm9 = vcmp.lt.s32.totalorder %v1202_v33, %v1203_v34 }
0x1098   : > { %v1205_v35 = vsel %vm1204_vm9, %v1202_v33, %v1203_v34 }
0x1099   : > { %v1206_v36 = vrot.slane %v1205_v35, 2 }
0x109b   : > { %vm1207_vm10 = vcmp.lt.s32.totalorder %v1205_v35, %v1206_v36 }
0x109c   : > { %v1208_v37 = vsel %vm1207_vm10, %v1205_v35, %v1206_v36 }
0x109d   : > { %v1209_v39 = vrot.slane %v1208_v37, 1 }
0x109f   : > { %vm1210_vm11 = vcmp.lt.s32.totalorder %v1208_v37, %v1209_v39 }
0x10a0   : > { %v1211_v40 = vsel %vm1210_vm11, %v1208_v37, %v1209_v39 }
0x10a1   : > { %vm1212_vm12 = vcmp.eq.s32.totalorder %v2241_v29, %v1211_v40 }
0x10a2   : > { %v1678_v41 = vsel %vm1212_vm12, 1.0, %v2100_v22 }
0x10a3   : > { %v1215_v42 = vmax.f32 %v1091_v1, %v1678_v41 }
0x10a5   : > { %v1260_v43 = vsel %vm324_vm5, %v1215_v42, 0.0  ;;  %v1216_v44 = vpack.c.bf16 %v1215_v42, %v1215_v42 }
0x10a6   : > { %1261 = vadd.xlane.f32.xlu1 %v1260_v43 }
0x10a7   : > { %1833 = vmatmul.mubr.msk.bf16.vlgmr.msra.gmra.mrb[32].mxu1 %vm175_vm0, %v1216_v44 }
0x10a8   : > { %1843 = vmatpush3.bf16.xpose.msra.mxu1 %v2245_v38  ;;  %1844 = vmatprep.mubr.msk.bf16.mxu1 %vm2101_vm1, %v2100_v22 }
0x10a9   : > { %1854 = vmatprep.subr.bf16.mxu1 %v2100_v22 }
0x1133   : > { %v1262_v46 = vpop.xlane.xlu1 %1261 }
0x1134   : > { %v1263_v47 = vadd.f32 1e-06, %v1262_v46 }
0x1136   : > { %1957 = vrcp.f32 %v1263_v47 }
0x1140   : > { %v1958_v48 = vpop.eup %1957 }
0x117a   : > { %v1254_v49 = vpop.f32.mrb[32].mxu1 }
0x117b   : > { %v1265_v50 = vmul.f32 %v1958_v48, %v1254_v49  ;;  %v1834_v51 = vpop.f32.mrb[33].mxu1 }
0x117c   : > { %v1257_v52 = vpop.f32.mrb[34].mxu1 }
0x117d   : > { %1959 = vlog2.f32 %v1265_v50  ;;  %v1272_v53 = vpack.c.bf16 %v1265_v50, %v1265_v50  ;;  %v1835_v54 = vpop.f32.mrb[35].mxu1 }
0x117f   : > { %1839 = vmatmul.mubr.msk.bf16.vlgmr.msra.gmra.mrb[32].mxu0 %vm279_vm3, %v1272_v53 }
0x1180   : > { %1849 = vmatpush3.bf16.msra.mxu0 %v2253_v45  ;;  %1850 = vmatprep.mubr.msk.bf16.mxu0 %vm2101_vm1, %v2100_v22 }
0x1187   : > { %v1960_v55 = vpop.eup %1959 }
0x1188   : > { %v1267_v56 = vmul.f32 0.6931472, %v1960_v55 }
0x118a   : > { %v1268_v57 = vmul.f32 %v1267_v56, %v1265_v50 }
0x118c   : > { %v1269_v58 = vsel %vm274_vm4, %v1268_v57, 0.0 }
0x118d   : > { %1270 = vadd.xlane.f32.xlu0 %v1269_v58 }
0x121a   : > { %v1271_v59 = vpop.xlane.xlu0 %1270 }
0x1252   : > { %v1310_v60 = vpop.f32.mrb[32].mxu0 }
0x1253   : > { %v1316_v61 = vsub.f32 %v1271_v59, %v1310_v60  ;;  %v1840_v62 = vpop.f32.mrb[33].mxu0 }
0x1254   : > { %v1313_v63 = vpop.f32.mrb[34].mxu0 }
0x1255   : > { %v1317_v0 = vsel %vm324_vm5, %v1316_v61, inf  ;;  %v1841_v1 = vpop.f32.mrb[35].mxu0 }
0x1256   : > { %v1318_v2 = vrot.slane %v1317_v0, 4 }
0x1258   : > { %v1319_v3 = vmin.f32 %v1317_v0, %v1318_v2 }
0x125a   : > { %v1320_v45 = vrot.slane %v1319_v3, 2 }
0x125c   : > { %v1321_v4 = vmin.f32 %v1319_v3, %v1320_v45 }
0x125e   : > { %v1322_v5 = vrot.slane %v1321_v4, 1 }
0x1260   : > { %v1323_v6 = vmin.f32 %v1321_v4, %v1322_v5 }
0x1262   : > { %vm1324_vm13 = vcmp.eq.f32.partialorder %v1316_v61, %v1323_v6 }
0x1263   : > { %v1325_v7 = vsel %vm1324_vm13, %v2241_v29, 4 }
0x1264   : > { %v1326_v8 = vsel %vm324_vm5, %v1325_v7, 2147483647 }
0x1265   : > { %v1327_v9 = vrot.slane %v1326_v8, 4 }
0x1267   : > { %vm1328_vm14 = vcmp.lt.s32.totalorder %v1326_v8, %v1327_v9 }
0x1268   : > { %v1329_v10 = vsel %vm1328_vm14, %v1326_v8, %v1327_v9 }
0x1269   : > { %v1330_v11 = vrot.slane %v1329_v10, 2 }
0x126b   : > { %vm1331_vm15 = vcmp.lt.s32.totalorder %v1329_v10, %v1330_v11 }
0x126c   : > { %v1332_v12 = vsel %vm1331_vm15, %v1329_v10, %v1330_v11 }
0x126d   : > { %v1333_v13 = vrot.slane %v1332_v12, 1 }
0x126f   : > { %vm1334_vm2 = vcmp.lt.s32.totalorder %v1332_v12, %v1333_v13 }
0x1270   : > { %v1335_v14 = vsel %vm1334_vm2, %v1332_v12, %v1333_v13 }
0x1271   : > { %vm1336_vm6 = vcmp.eq.s32.totalorder %v2241_v29, %v1335_v14 }
0x1272   : > { %v1681_v15 = vsel %vm1336_vm6, 1.0, %v2100_v22 }
0x1273   : > { %v1339_v16 = vmax.f32 %v1215_v42, %v1681_v15 }
0x1275   : > { %v1384_v17 = vsel %vm324_vm5, %v1339_v16, 0.0  ;;  %v1340_v18 = vpack.c.bf16 %v1339_v16, %v1339_v16 }
0x1276   : > { %1385 = vadd.xlane.f32.xlu1 %v1384_v17 }
0x1277   : > { %1845 = vmatmul.mubr.msk.bf16.vlgmr.msra.gmra.mrb[36].mxu1 %vm175_vm0, %v1340_v18 }
0x1278   : > { %1855 = vmatpush3.bf16.xpose.msra.mxu1 %v2245_v38  ;;  %1856 = vmatprep.mubr.msk.bf16.mxu1 %vm2101_vm1, %v2100_v22 }
0x1303   : > { %v1386_v19 = vpop.xlane.xlu1 %1385 }
0x1304   : > { %v1387_v20 = vadd.f32 1e-06, %v1386_v19 }
0x1306   : > { %1961 = vrcp.f32 %v1387_v20 }
0x1310   : > { %v1962_v21 = vpop.eup %1961 }
0x134a   : > { %v1378_v23 = vpop.f32.mrb[36].mxu1 }
0x134b   : > { %v1389_v24 = vmul.f32 %v1962_v21, %v1378_v23  ;;  %v1846_v25 = vpop.f32.mrb[37].mxu1 }
0x134c   : > { %v1381_v26 = vpop.f32.mrb[38].mxu1 }
0x134d   : > { %1963 = vlog2.f32 %v1389_v24  ;;  %v1396_v27 = vpack.c.bf16 %v1389_v24, %v1389_v24  ;;  %v1847_v28 = vpop.f32.mrb[39].mxu1 }
0x134f   : > { %1851 = vmatmul.mubr.msk.bf16.vlgmr.msra.gmra.mrb[36].mxu0 %vm279_vm3, %v1396_v27 }
0x1357   : > { %v1964_v30 = vpop.eup %1963 }
0x1358   : > { %v1391_v31 = vmul.f32 0.6931472, %v1964_v30 }
0x135a   : > { %v1392_v32 = vmul.f32 %v1391_v31, %v1389_v24 }
0x135c   : > { %v1393_v38 = vsel %vm274_vm4, %v1392_v32, 0.0 }
0x135d   : > { %1394 = vadd.xlane.f32.xlu0 %v1393_v38 }
0x13ea   : > { %v1395_v33 = vpop.xlane.xlu0 %1394 }
0x1422   : > { %v1434_v34 = vpop.f32.mrb[36].mxu0 }
0x1423   : > { %v1440_v35 = vsub.f32 %v1395_v33, %v1434_v34  ;;  %v1852_v36 = vpop.f32.mrb[37].mxu0 }
0x1424   : > { %v1437_v37 = vpop.f32.mrb[38].mxu0 }
0x1425   : > { %v1441_v39 = vsel %vm324_vm5, %v1440_v35, inf  ;;  %v1853_v40 = vpop.f32.mrb[39].mxu0 }
0x1426   : > { %v1442_v41 = vrot.slane %v1441_v39, 4 }
0x1428   : > { %v1443_v42 = vmin.f32 %v1441_v39, %v1442_v41 }
0x142a   : > { %v1444_v43 = vrot.slane %v1443_v42, 2 }
0x142c   : > { %v1445_v44 = vmin.f32 %v1443_v42, %v1444_v43 }
0x142e   : > { %v1446_v46 = vrot.slane %v1445_v44, 1 }
0x1430   : > { %v1447_v47 = vmin.f32 %v1445_v44, %v1446_v46 }
0x1432   : > { %vm1448_vm1 = vcmp.eq.f32.partialorder %v1440_v35, %v1447_v47 }
0x1433   : > { %v1449_v48 = vsel %vm1448_vm1, %v2241_v29, 4 }
0x1434   : > { %v1450_v49 = vsel %vm324_vm5, %v1449_v48, 2147483647 }
0x1435   : > { %v1451_v50 = vrot.slane %v1450_v49, 4 }
0x1437   : > { %vm1452_vm3 = vcmp.lt.s32.totalorder %v1450_v49, %v1451_v50 }
0x1438   : > { %v1453_v51 = vsel %vm1452_vm3, %v1450_v49, %v1451_v50 }
0x1439   : > { %v1454_v52 = vrot.slane %v1453_v51, 2 }
0x143b   : > { %vm1455_vm7 = vcmp.lt.s32.totalorder %v1453_v51, %v1454_v52 }
0x143c   : > { %v1456_v53 = vsel %vm1455_vm7, %v1453_v51, %v1454_v52 }
0x143d   : > { %v1457_v54 = vrot.slane %v1456_v53, 1 }
0x143f   : > { %vm1458_vm9 = vcmp.lt.s32.totalorder %v1456_v53, %v1457_v54 }
0x1440   : > { %v1459_v55 = vsel %vm1458_vm9, %v1456_v53, %v1457_v54 }
0x1441   : > { %vm1460_vm10 = vcmp.eq.s32.totalorder %v2241_v29, %v1459_v55  ;;  %1515 = vst.msk [vmem:[%s164_s3] sm:$0x1] %vm1514_vm8, %v1459_v55 }
0x1442   : > { %v1684_v56 = vsel %vm1460_vm10, 1.0, %v2100_v22 }
0x1443   : > { %v1463_v57 = vmax.f32 %v1339_v16, %v1684_v56 }
0x1445   : > { %v1508_v58 = vsel %vm324_vm5, %v1463_v57, 0.0  ;;  %v1464_v59 = vpack.c.bf16 %v1463_v57, %v1463_v57 }
0x1446   : > { %1509 = vadd.xlane.f32.xlu1 %v1508_v58 }
0x1447   : > { %1857 = vmatmul.mubr.msk.bf16.vlgmr.msra.gmra.mrb[40].mxu1 %vm175_vm0, %v1464_v59 }
0x1448   : > { %2010 = shalt.err (!%p2007_p2)
}
0x1449   : > { %s2011_s26 = scalar_lea.hbm %s2424_s14, 16  ;;  %s2015_s6 = scalar_lea.hbm %s2495_s1, 32 }
0x144a   : > { %p2012_p4 = scmp.ne.s32.totalorder %s2424_s14, %s2011_s26  ;;  %p2016_p9 = scmp.lt.u32.totalorder %s2424_s14, %s2495_s1 }
0x144b   : > { %p2017_p1 = scmp.lt.u32.totalorder %s2015_s6, %s2011_s26  ;;  %p2019_p6 = scmp.lt.u32.totalorder %s2011_s26, %s2424_s14 }
0x144c   : > { %p2013_p5 = pnand %p2012_p4, %p2503_p11 }
0x144d   : > { %p2018_p3 = por %p2017_p1, %p2016_p9 }
0x144e   : > { %p2014_p7 = pneg %p2013_p5 }
0x144f   : > { %p2020_p12 = por %p2019_p6, %p2018_p3 }
0x1451   : > { %p2021_p13 = pnand %p2020_p12, %p2014_p7 }
0x1453   : > { %2024 = shalt.err (!%p2021_p13)
}
0x1454   : > { %1868 = dma.vmem_to_hbm [thread:$0]  (%p2503_p11), %s1536_s16, 16, %s2424_s14, %s1518_s17  }
0x1455   : > { %s1654_s30 = sshll.u32 %s2223_s27, 2  ;;  %s1688_s3 = sshll.u32 %s2140_s13, 6 }
0x1456   : > { %s171_s4 = scalar_lea.vmem [#allocation6], %s1654_s30  ;;  %s2449_s23 = scalar_lea.hbm %s2496_s2, %s1688_s3 }
0x1457   : > { %s1548_s7 = sshll.u32 %s171_s4, 4  ;;  %s1522_s13 = scalar_lea.sflag [#allocation7], %s2223_s27  ;;  %s2451_s7 = int_to_ptr.vmem [resolvable:$true] %s1548_s7 }
0x1458   : > { %s2025_s14 = scalar_lea.vmem %s2451_s7, 64  ;;  %s2103_s16 = smov [#allocation6]  }
0x1459   : > { %p2026_p8 = scmp.ne.s32.totalorder %s2451_s7, %s2025_s14  ;;  %s2029_s17 = sshll.u32 %s2103_s16, 4  ;;  %s2030_s17 = int_to_ptr.vmem [resolvable:$false] %s2029_s17 }
0x145a   : > { %s2031_s24 = scalar_lea.vmem %s2030_s17, 128  ;;  %p2032_p2 = scmp.lt.s32.totalorder %s2451_s7, %s2030_s17 }
0x145b   : > { %p2027_p10 = pnand %p2026_p8, %p2503_p11  ;;  %p2033_p4 = scmp.lt.s32.totalorder %s2031_s24, %s2025_s14 }
0x145d   : > { %p2028_p0 = pneg %p2027_p10  ;;  %p2034_p5 = por %p2033_p4, %p2032_p2 }
0x145f   : > { %p2035_p7 = pnand %p2034_p5, %p2028_p0 }
0x14d3   : > { %v1510_v22 = vpop.xlane.xlu1 %1509 }
0x14d4   : > { %v1511_v29 = vadd.f32 1e-06, %v1510_v22 }
0x14d6   : > { %1965 = vrcp.f32 %v1511_v29 }
0x14e0   : > { %v1966_v60 = vpop.eup %1965 }
0x151a   : > { %v1502_v61 = vpop.f32.mrb[40].mxu1 }
0x151b   : > { %v1513_v62 = vmul.f32 %v1966_v60, %v1502_v61  ;;  %v1858_v63 = vpop.f32.mrb[41].mxu1 }
0x151c   : > { %v1505_v0 = vpop.f32.mrb[42].mxu1 }
0x151d   : > { %v1859_v1 = vpop.f32.mrb[43].mxu1  ;;  %1516 = vst.msk [vmem:[%s171_s4] sm:$0xf] %vm274_vm4, %v1513_v62 }
0x151e   : > { %2038 = shalt.err (!%p2035_p7)
}
0x151f   : > { %s2039_s27 = scalar_lea.hbm %s2449_s23, 64  ;;  %s2043_s29 = scalar_lea.hbm %s2496_s2, 128 }
0x1520   : > { %p2040_p9 = scmp.ne.s32.totalorder %s2449_s23, %s2039_s27  ;;  %p2044_p6 = scmp.lt.u32.totalorder %s2449_s23, %s2496_s2 }
0x1521   : > { %p2045_p12 = scmp.lt.u32.totalorder %s2043_s29, %s2039_s27  ;;  %p2047_p8 = scmp.lt.u32.totalorder %s2039_s27, %s2449_s23 }
0x1522   : > { %p2041_p1 = pnand %p2040_p9, %p2503_p11 }
0x1523   : > { %p2046_p13 = por %p2045_p12, %p2044_p6 }
0x1524   : > { %p2042_p3 = pneg %p2041_p1 }
0x1525   : > { %p2048_p10 = por %p2047_p8, %p2046_p13 }
0x1527   : > { %p2049_p0 = pnand %p2048_p10, %p2042_p3 }
0x1529   : > { %2052 = shalt.err (!%p2049_p0)
}
0x152a   : > { %1869 = dma.vmem_to_hbm [thread:$0]  (%p2503_p11), %s2451_s7, 64, %s2449_s23, %s1522_s13  }
0x152b PF: > { %s1560_s28 = sand.u32 1, %s2083_s9   ;;  %p2504_p2 = scmp.ne.s32.totalorder %s2501_s22, 0 }
0x152c   : > { %p2505_p4 = scmp.ge.s32.totalorder %s2095_s12, 2  ;;  %s1561_s20 = scalar_lea.sflag [#allocation4], %s1560_s28 }
0x152e   : > { %p1877_p5 = pnand %p2505_p4, %p2504_p2 }
0x1530   : > { %2074 = dma.done.wait (!%p1877_p5), %s1561_s20, 16  }
0x1531   : > { %2076 = vsyncadd (!%p1877_p5), %s1561_s20, 4294967280  ;;  %s1569_s30 = scalar_lea.sflag [#allocation7], %s1560_s28 }
0x1532   : > { %2078 = dma.done.wait (!%p1877_p5), %s1569_s30, 64  }
0x1533   : > { %2080 = vsyncadd (!%p1877_p5), %s1569_s30, 4294967232  ;;  %p19_p11 = scmp.ge.s32.totalorder %s2144_s15, 4   ;;  %s2506_s9 = smov %s2087_s10 }
0x1534   : > { %s2507_s10 = smov %s2091_s11  ;;  %s2508_s11 = smov %s2156_s18 }
0x1535   : > { %s2509_s12 = smov %s2144_s15  ;;  %21 = sbr.rel (!%p19_p11) target bundleno = 7 (0x7), region = 86 }
0x153c   :  { %1574 = vsyncpa [#allocation3], 1 }
0x153d   :  { %1576 = vsyncpa [#allocation3 + $0x1], 1 }
0x153e   :  { %1577 = vsyncpa [#allocation4], 1 }
0x153f   :  { %1579 = vsyncpa [#allocation4 + $0x1], 1 }
0x1540   :  { %1580 = vsyncpa [#allocation7], 1 }
0x1541   :  { %1582 = vsyncpa [#allocation7 + $0x1], 1 }

</bundles_post_ra>
